<compile_context>
chip_gen: v6e
topology: v6e:2x2x1
jax: 0.10.0
libtpu: 0.0.40
codegen_flags: <defaults>
</compile_context>

<pallas_src>
import numpy as np
import jax
import jax.numpy as jnp
from jax.experimental import pallas as pl
from jax.experimental.pallas import tpu as pltpu

N_EXPS = 8


# ---------------------------------------------------------------------------
# Kernel: one grid step = one adaptor instance g, one token_size chunk k.
# ---------------------------------------------------------------------------
def _moe_adaptor_kernel(x_ref, w_gate_ref, w_aug_ref, out_ref):
    """
    x_ref:      [1, B, E]        f32   input activations (resident)
    w_gate_ref: [1, E, N]        f32   gating weight     (resident)
    w_aug_ref:  [1, K_aug, tk]   bf16  augmented expert weights (chunk of T)
                                        rows 0..N*E-1  : stacked W_e^T
                                        rows N*E..+N-1 : bias_proj (b_e @ W_e^T)
                                        rows ..K_aug-1 : zero padding
    out_ref:    [1, B, tk]             MoE output chunk
    """
    x = x_ref[0].astype(jnp.float32)                        # [B, E]
    w_gate = w_gate_ref[0].astype(jnp.float32)              # [E, N]
    B, E = x.shape
    N = w_gate.shape[1]
    K_aug = w_aug_ref.shape[1]
    pad = K_aug - N * E - N

    # --- gating softmax (tiny; exp runs on the otherwise-idle EUP slot) -----
    logits = jnp.dot(x, w_gate, preferred_element_type=jnp.float32)   # [B, N]
    gates = jax.nn.softmax(logits, axis=-1)                           # [B, N]

    # --- augmented activation row: [g_0*x | ... | g_{N-1}*x | -g | 0-pad] ----
    pieces = [gates[:, e:e + 1] * x for e in range(N)]      # N x [B, E]
    pieces.append(-gates)                                   # [B, N]
    if pad:
        pieces.append(jnp.zeros((B, pad), jnp.float32))     # [B, pad]
    xg_aug = jnp.concatenate(pieces, axis=-1).astype(w_aug_ref.dtype)  # [B, K_aug]

    # --- single wide MXU matmul (lane-dense output), f32 accumulation -------
    out = jnp.dot(xg_aug, w_aug_ref[0], preferred_element_type=jnp.float32)
    out_ref[0] = out.astype(out_ref.dtype)


# ---------------------------------------------------------------------------
# Parameter prep (do ONCE at init, not per call)
# ---------------------------------------------------------------------------
def prepare_moe_params(w_gate, pw_bias, expert_w, weight_dtype=jnp.bfloat16):
    """Re-layout MoEAdaptorLayer parameters for the kernel.

    w_gate:   [E, n_exps]       gating weight
    pw_bias:  [n_exps, E]       stacked PWLayer biases
    expert_w: [n_exps, T, E]    stacked PWLayer nn.Linear weights ([out, in])

    returns (w_gate [E, n_exps] f32,
             w_aug  [K_aug, T]  weight_dtype) with K_aug = pad16(n_exps*E + n_exps)
    """
    n_exps, T, E = expert_w.shape
    w_big = jnp.transpose(expert_w.astype(jnp.float32), (0, 2, 1)).reshape(n_exps * E, T)
    bias_proj = jnp.einsum('ei,eti->et',
                           pw_bias.astype(jnp.float32),
                           expert_w.astype(jnp.float32))               # [n_exps, T]
    k_raw = n_exps * E + n_exps
    pad = (-k_raw) % 16                                                # bf16 sublane packing
    parts = [w_big, bias_proj]
    if pad:
        parts.append(jnp.zeros((pad, T), jnp.float32))
    w_aug = jnp.concatenate(parts, axis=0).astype(weight_dtype)        # [K_aug, T]
    return w_gate.astype(jnp.float32), w_aug


# ---------------------------------------------------------------------------
# Forward wrapper
# ---------------------------------------------------------------------------
def _tensorcores_per_chip():
    try:
        kind = jax.devices()[0].device_kind.lower()
    except Exception:
        return 1
    return 2 if "v7" in kind else 1


def moe_adaptor_forward(x, w_gate, w_aug, *, tk=None):
    """Eval-mode MoEAdaptorLayer.forward for one or several stacked instances.

    x:      [B, E]         (single adaptor)  or [G, B, E]
    w_gate: [E, n_exps]                      or [G, E, n_exps]
    w_aug:  [K_aug, T]                       or [G, K_aug, T]
    returns moe output [B, T] (or [G, B, T])
    """
    squeeze = (x.ndim == 2)
    if squeeze:
        x, w_gate, w_aug = x[None], w_gate[None], w_aug[None]

    G, B, E = x.shape
    _, _, N = w_gate.shape
    _, K_aug, T = w_aug.shape
    assert K_aug >= N * E + N and K_aug % 8 == 0

    if tk is None:
        # Single grid step per adaptor on single-TC chips; split T across the
        # two TensorCores of v7x when only one adaptor instance is present.
        tk = T if T <= 4096 else 2048
        if (G == 1 and _tensorcores_per_chip() >= 2
                and T % 2 == 0 and (T // 2) % 128 == 0 and T // 2 >= 512):
            tk = T // 2
    assert T % tk == 0 and (tk == T or tk % 128 == 0)

    out = pl.pallas_call(
        _moe_adaptor_kernel,
        out_shape=jax.ShapeDtypeStruct((G, B, T), x.dtype),
        grid=(G, T // tk),
        in_specs=[
            pl.BlockSpec((1, B, E), lambda g, k: (g, 0, 0)),       # x (resident)
            pl.BlockSpec((1, E, N), lambda g, k: (g, 0, 0)),       # w_gate (resident)
            pl.BlockSpec((1, K_aug, tk), lambda g, k: (g, 0, k)),  # augmented weights
        ],
        out_specs=pl.BlockSpec((1, B, tk), lambda g, k: (g, 0, k)),
        compiler_params=pltpu.CompilerParams(
            dimension_semantics=("parallel", "parallel"),
            vmem_limit_bytes=32 * 1024 * 1024,   # conservative: safe on v7x (64 MiB phys)
        ),
    )(x.astype(jnp.float32), w_gate.astype(jnp.float32), w_aug)

    return out[0] if squeeze else out


# ---------------------------------------------------------------------------
# Pure-JAX reference (mirrors the PyTorch module in eval mode)
# ---------------------------------------------------------------------------
def _moe_reference(x, w_gate, pw_bias, expert_w):
    gates = jax.nn.softmax(x @ w_gate, axis=-1)                    # [B, n_exps]
    xe = x[None, :, :] - pw_bias[:, None, :]                       # [e, B, E]
    eo = jnp.einsum('ebi,eti->ebt', xe, expert_w)                  # [e, B, T]
    return jnp.einsum('be,ebt->bt', gates, eo)                     # [B, T]


# ---------------------------------------------------------------------------
# Demo / self-check
# ---------------------------------------------------------------------------
if __name__ == "__main__":
    # Small shapes consistent with the module: batch=2, embed=64 (default),
    # token_size=1024 (scaled down from the 4096 default), n_exps=8.
    B, E, T, N = 2, 64, 1024, N_EXPS
    key = jax.random.PRNGKey(0)
    keys = jax.random.split(key, 8)

    def make_adaptor(k):
        k1, k2, k3 = jax.random.split(k, 3)
        # The PyTorch module initializes w_gate / PWLayer biases to zeros; small
        # random values are used here so the numeric check actually exercises
        # the gating softmax and the (x - bias) path.
        w_gate = 0.1 * jax.random.normal(k1, (E, N), jnp.float32)
        pw_bias = 0.1 * jax.random.normal(k2, (N, E), jnp.float32)
        expert_w = 0.02 * jax.random.normal(k3, (N, T, E), jnp.float32)
        return w_gate, pw_bias, expert_w

    # Two independent MoEAdaptorLayer instances (e.g. user / item adaptors),
    # fused into a single pallas_call via the leading "parallel" grid axis.
    adaptors = [make_adaptor(keys[0]), make_adaptor(keys[1])]
    x = jax.random.normal(keys[2], (2, B, E), jnp.float32)          # [G, B, E]

    prepped = [prepare_moe_params(*a) for a in adaptors]
    w_gate_s = jnp.stack([p[0] for p in prepped])                   # [G, E, N]
    w_aug_s = jnp.stack([p[1] for p in prepped])                    # [G, K_aug, T] bf16

    out = moe_adaptor_forward(x, w_gate_s, w_aug_s)
    jax.block_until_ready(out)

    for g in range(2):
        ref = _moe_reference(x[g], *adaptors[g])
        np.testing.assert_allclose(np.asarray(out[g]), np.asarray(ref),
                                   rtol=2e-2, atol=2e-2)

    # Single-instance path (exactly one MoEAdaptorLayer.forward).
    out1 = moe_adaptor_forward(x[0], *prepped[0])
    jax.block_until_ready(out1)
    np.testing.assert_allclose(np.asarray(out1),
                               np.asarray(_moe_reference(x[0], *adaptors[0])),
                               rtol=2e-2, atol=2e-2)

    print("KERNEL_OK")
</pallas_src>

<mosaic_0001>
module attributes {stable_mosaic.version = 11 : i64} {
  func.func @_moe_adaptor_kernel(%arg0: i32, %arg1: i32, %arg2: memref<1x2x64xf32, #tpu.memory_space<vmem>>, %arg3: memref<1x64x8xf32, #tpu.memory_space<vmem>>, %arg4: memref<1x528x1024xbf16, #tpu.memory_space<vmem>>, %arg5: memref<1x2x1024xf32, #tpu.memory_space<vmem>>) attributes {dimension_semantics = [#tpu.dimension_semantics<parallel>, #tpu.dimension_semantics<parallel>], iteration_bounds = array<i64: 2, 1>, scalar_prefetch = 0 : i64, scratch_operands = 0 : i64, tpu.core_type = #tpu.core_type<tc>, window_params = [{transform_indices = @transform_0, window_bounds = array<i64: 1, 2, 64>}, {transform_indices = @transform_1, window_bounds = array<i64: 1, 64, 8>}, {transform_indices = @transform_2, window_bounds = array<i64: 1, 528, 1024>}, {transform_indices = @transform_3, window_bounds = array<i64: 1, 2, 1024>}]} {
    %c0 = arith.constant 0 : index
    %c0_0 = arith.constant 0 : index
    %c0_1 = arith.constant 0 : index
    %0 = vector.load %arg2[%c0, %c0_0, %c0_1] : memref<1x2x64xf32, #tpu.memory_space<vmem>>, vector<1x2x64xf32>
    %1 = vector.shape_cast %0 : vector<1x2x64xf32> to vector<2x64xf32>
    %c0_2 = arith.constant 0 : index
    %c0_3 = arith.constant 0 : index
    %c0_4 = arith.constant 0 : index
    %2 = vector.load %arg3[%c0_2, %c0_3, %c0_4] : memref<1x64x8xf32, #tpu.memory_space<vmem>>, vector<1x64x8xf32>
    %3 = vector.shape_cast %2 : vector<1x64x8xf32> to vector<64x8xf32>
    %cst = arith.constant dense<0.000000e+00> : vector<2x8xf32>
    %4 = tpu.matmul %1, %3, %cst {dimension_numbers = #tpu.dot_dimension_numbers<[1], [0], [0], [1], [0, 0, 1, 1], [], []>} : vector<2x64xf32>, vector<64x8xf32>, vector<2x8xf32> -> vector<2x8xf32>
    %cst_5 = arith.constant dense<0xFF800000> : vector<2xf32>
    %5 = vector.multi_reduction <maximumf>, %4, %cst_5 [1] : vector<2x8xf32> to vector<2xf32>
    %cst_6 = arith.constant 0xFF800000 : f32
    %6 = vector.broadcast %cst_6 : f32 to vector<2xf32>
    %7 = arith.maximumf %6, %5 : vector<2xf32>
    %8 = vector.shape_cast %7 : vector<2xf32> to vector<2x1xf32>
    %9 = vector.broadcast %8 : vector<2x1xf32> to vector<2x8xf32>
    %10 = arith.subf %4, %9 : vector<2x8xf32>
    %11 = math.exp %10 : vector<2x8xf32>
    %cst_7 = arith.constant dense<0.000000e+00> : vector<2xf32>
    %12 = vector.multi_reduction <add>, %11, %cst_7 [1] : vector<2x8xf32> to vector<2xf32>
    %13 = vector.shape_cast %12 : vector<2xf32> to vector<2x1xf32>
    %14 = vector.broadcast %13 : vector<2x1xf32> to vector<2x8xf32>
    %15 = arith.divf %11, %14 : vector<2x8xf32>
    %16 = vector.extract_strided_slice %15 {offsets = [0, 0], sizes = [2, 1], strides = [1, 1]} : vector<2x8xf32> to vector<2x1xf32>
    %17 = vector.broadcast %16 : vector<2x1xf32> to vector<2x64xf32>
    %18 = arith.mulf %17, %1 : vector<2x64xf32>
    %19 = vector.extract_strided_slice %15 {offsets = [0, 1], sizes = [2, 1], strides = [1, 1]} : vector<2x8xf32> to vector<2x1xf32>
    %20 = vector.broadcast %19 : vector<2x1xf32> to vector<2x64xf32>
    %21 = arith.mulf %20, %1 : vector<2x64xf32>
    %22 = vector.extract_strided_slice %15 {offsets = [0, 2], sizes = [2, 1], strides = [1, 1]} : vector<2x8xf32> to vector<2x1xf32>
    %23 = vector.broadcast %22 : vector<2x1xf32> to vector<2x64xf32>
    %24 = arith.mulf %23, %1 : vector<2x64xf32>
    %25 = vector.extract_strided_slice %15 {offsets = [0, 3], sizes = [2, 1], strides = [1, 1]} : vector<2x8xf32> to vector<2x1xf32>
    %26 = vector.broadcast %25 : vector<2x1xf32> to vector<2x64xf32>
    %27 = arith.mulf %26, %1 : vector<2x64xf32>
    %28 = vector.extract_strided_slice %15 {offsets = [0, 4], sizes = [2, 1], strides = [1, 1]} : vector<2x8xf32> to vector<2x1xf32>
    %29 = vector.broadcast %28 : vector<2x1xf32> to vector<2x64xf32>
    %30 = arith.mulf %29, %1 : vector<2x64xf32>
    %31 = vector.extract_strided_slice %15 {offsets = [0, 5], sizes = [2, 1], strides = [1, 1]} : vector<2x8xf32> to vector<2x1xf32>
    %32 = vector.broadcast %31 : vector<2x1xf32> to vector<2x64xf32>
    %33 = arith.mulf %32, %1 : vector<2x64xf32>
    %34 = vector.extract_strided_slice %15 {offsets = [0, 6], sizes = [2, 1], strides = [1, 1]} : vector<2x8xf32> to vector<2x1xf32>
    %35 = vector.broadcast %34 : vector<2x1xf32> to vector<2x64xf32>
    %36 = arith.mulf %35, %1 : vector<2x64xf32>
    %37 = vector.extract_strided_slice %15 {offsets = [0, 7], sizes = [2, 1], strides = [1, 1]} : vector<2x8xf32> to vector<2x1xf32>
    %38 = vector.broadcast %37 : vector<2x1xf32> to vector<2x64xf32>
    %39 = arith.mulf %38, %1 : vector<2x64xf32>
    %cst_8 = arith.constant 0.000000e+00 : f32
    %40 = vector.broadcast %cst_8 : f32 to vector<2x8xf32>
    %41 = arith.subf %40, %15 : vector<2x8xf32>
    %cst_9 = arith.constant 0.000000e+00 : f32
    %42 = vector.broadcast %cst_9 : f32 to vector<2x8xf32>
    %43 = tpu.concatenate %18, %21, %24, %27, %30, %33, %36, %39, %41, %42 in 1 : vector<2x64xf32>, vector<2x64xf32>, vector<2x64xf32>, vector<2x64xf32>, vector<2x64xf32>, vector<2x64xf32>, vector<2x64xf32>, vector<2x64xf32>, vector<2x8xf32>, vector<2x8xf32> -> vector<2x528xf32>
    %44 = arith.truncf %43 : vector<2x528xf32> to vector<2x528xbf16>
    %c0_10 = arith.constant 0 : index
    %c0_11 = arith.constant 0 : index
    %c0_12 = arith.constant 0 : index
    %45 = vector.load %arg4[%c0_10, %c0_11, %c0_12] : memref<1x528x1024xbf16, #tpu.memory_space<vmem>>, vector<1x528x1024xbf16>
    %46 = vector.shape_cast %45 : vector<1x528x1024xbf16> to vector<528x1024xbf16>
    %cst_13 = arith.constant dense<0.000000e+00> : vector<2x1024xf32>
    %47 = tpu.matmul %44, %46, %cst_13 {dimension_numbers = #tpu.dot_dimension_numbers<[1], [0], [0], [1], [0, 0, 1, 1], [], []>} : vector<2x528xbf16>, vector<528x1024xbf16>, vector<2x1024xf32> -> vector<2x1024xf32>
    %c0_14 = arith.constant 0 : index
    %c0_15 = arith.constant 0 : index
    %c0_16 = arith.constant 0 : index
    %48 = vector.load %arg5[%c0_14, %c0_15, %c0_16] : memref<1x2x1024xf32, #tpu.memory_space<vmem>>, vector<1x2x1024xf32>
    %49 = vector.shape_cast %48 : vector<1x2x1024xf32> to vector<2x1024xf32>
    %50 = vector.shape_cast %47 : vector<2x1024xf32> to vector<1x2x1024xf32>
    tpu.vector_store %arg5[%c0_14, %c0_15, %c0_16], %50 {strides = array<i32>} : memref<1x2x1024xf32, #tpu.memory_space<vmem>>, vector<1x2x1024xf32>,
    return
  }
  func.func @transform_0(%arg0: i32, %arg1: i32) -> (i32, i32, i32) {
    %c0_i32 = arith.constant 0 : i32
    %c0_i32_0 = arith.constant 0 : i32
    %c0_i32_1 = arith.constant 0 : i32
    return %arg0, %c0_i32, %c0_i32_0 : i32, i32, i32
  }
  func.func @transform_1(%arg0: i32, %arg1: i32) -> (i32, i32, i32) {
    %c0_i32 = arith.constant 0 : i32
    %c0_i32_0 = arith.constant 0 : i32
    %c0_i32_1 = arith.constant 0 : i32
    return %arg0, %c0_i32, %c0_i32_0 : i32, i32, i32
  }
  func.func @transform_2(%arg0: i32, %arg1: i32) -> (i32, i32, i32) {
    %c0_i32 = arith.constant 0 : i32
    %c0_i32_0 = arith.constant 0 : i32
    return %arg0, %c0_i32, %arg1 : i32, i32, i32
  }
  func.func @transform_3(%arg0: i32, %arg1: i32) -> (i32, i32, i32) {
    %c0_i32 = arith.constant 0 : i32
    %c0_i32_0 = arith.constant 0 : i32
    return %arg0, %c0_i32, %arg1 : i32, i32, i32
  }
}

</mosaic_0001>

<bundles_post_ra>
// kernel: tpu_custom_call.1
= control target key start
LH: loop header
LB: loop body
LE: loop exit
PB: predicated region body
PF: predicated region fallthrough
CT: control target
= control target key end

     0   :  { %8 = vsyncpa [#allocation3], 0  ;;  %s3834_s0 = inlined_call_operand.hbm [shape: f32[2,2,64], index: 0, kind: input, shape index: {}]   ;;  %s3835_s1 = inlined_call_operand.vmem [shape: f32[2,64,8], index: 1, kind: input, shape index: {}]   ;;  %s3836_s2 = inlined_call_operand.hbm [shape: bf16[2,528,1024], index: 2, kind: input, shape index: {}]   ;;  %s3837_s3 = inlined_call_operand.hbm [shape: f32[2,2,1024], index: 3, kind: output, shape index: {}]  }
   0x1   :  { %10 = vsyncpa [#allocation3 + $0x1], 0 }
   0x2   :  { %11 = vsyncpa [#allocation6], 0 }
   0x3   :  { %13 = vsyncpa [#allocation6 + $0x1], 0 }
   0x4   :  { %14 = vsyncpa [#allocation4], 0 }
   0x5   :  { %16 = vsyncpa [#allocation4 + $0x1], 0  ;;  %s3294_s12 = smov 0   ;;  %s3296_s13 = smov 0  }
   0x6   :  { %s3298_s14 = smov 0   ;;  %s3300_s15 = smov 0  }
   0x7   :  { %s3302_s16 = smov 0   ;;  %s3304_s17 = smov 0  }
   0x8 LB: > { %s2693_s18 = sadd.s32 4294967295, %s3255_s17   ;;  %s2694_s19 = sadd.s32 4294967294, %s3255_s17   ;;  %s3255_s17 = sphi %s3304_s17, %s22_s17   ;;  %s3251_s16 = sphi %s3302_s16, %s3849_s16   ;;  %s3247_s15 = sphi %s3300_s15, %s3848_s15   ;;  %s3243_s14 = sphi %s3298_s14, %s3847_s14   ;;  %s3239_s13 = sphi %s3296_s13, %s3846_s13   ;;  %s3235_s12 = sphi %s3294_s12, %s3845_s12  }
   0x9   : > { %s34_s20 = sadd.s32 1, %s3251_s16  ;;  %s41_s21 = sadd.s32 1, %s3243_s14 }
   0xa   : > { %p36_p0 = scmp.ge.s32.totalorder %s34_s20, 2  ;;  %p48_p1 = scmp.ne.s32.totalorder %s3243_s14, %s3239_s13 }
   0xb   : > { %p49_p2 = scmp.eq.s32.totalorder %s3255_s17, 0  ;;  %p54_p3 = scmp.ne.s32.totalorder %s3239_s13, %s3235_s12 }
   0xc   : > { %s3851_s20 = smov (%p36_p0, %s34_s20), 0  ;;  %p55_p5 = scmp.eq.s32.totalorder %s2693_s18, 0 }
   0xd   : > { %p3335_p4 = por %p49_p2, %p48_p1  ;;  %s38_s23 = ssub.s32 %s3251_s16, %s3851_s20 }
   0xe   : > { %p134_p6 = scmp.eq.s32.totalorder %s2693_s18, 1  ;;  %p39_p7 = scmp.eq.s32.totalorder %s38_s23, 0 }
   0xf   : > { %p3341_p8 = por %p55_p5, %p54_p3  ;;  %p140_p10 = scmp.eq.s32.totalorder %s2694_s19, 1 }
  0x10   : > { %p3345_p9 = por %p134_p6, %p48_p1  ;;  %p3029_p13 = scmp.lt.s32.totalorder %s3255_s17, 2 }
  0x11   : > { %s3350_s26 = scalar_select %p39_p7, %s3243_s14, %s41_s21  }
  0x12   : > { %p3352_p11 = por %p140_p10, %p54_p3  ;;  %s3359_s28 = sand.u32 1, %s3243_s14  }
  0x13   : > { %s2697_s29 = sshll.u32 %s3359_s28, 1  ;;  %s2698_s30 = sshll.u32 %s3251_s16, 5 }
  0x14   : > { %s169_s6 = scalar_lea.hbm %s3834_s0, %s2698_s30  ;;  %s164_s7 = scalar_lea.vmem [#allocation2], %s2697_s29 }
  0x15   : > { %s171_s8 = sshll.u32 %s164_s7, 4  ;;  %p3368_p0 = pnand %p3029_p13, %p3335_p4  ;;  %s172_s8 = int_to_ptr.vmem [resolvable:$true] %s171_s8 }
  0x16   : > { %p2700_p1 = scmp.ge.s32.totalorder %s3255_s17, 1  ;;  %p207_p2 = scmp.lt.s32.totalorder %s3255_s17, 3 }
  0x17   : > { %s161_s10 = scalar_lea.sflag [#allocation3], %s3359_s28  ;;  %p3117_p3 = pneg %p3368_p0 }
  0x18   : > { %s3128_s11 = scalar_lea.vmem %s172_s8, 32  ;;  %s3257_s18 = smov [#allocation2]  }
  0x19   : > { %p3129_p5 = scmp.ne.s32.totalorder %s172_s8, %s3128_s11  ;;  %s3133_s19 = sshll.u32 %s3257_s18, 4  ;;  %s3134_s19 = int_to_ptr.vmem [resolvable:$false] %s3133_s19 }
  0x1a   : > { %s3135_s21 = scalar_lea.vmem %s3134_s19, 64  ;;  %p3136_p4 = scmp.lt.s32.totalorder %s172_s8, %s3134_s19 }
  0x1b   : > { %p3131_p6 = pnand %p3129_p5, %p3117_p3  ;;  %p3137_p10 = scmp.lt.s32.totalorder %s3135_s21, %s3128_s11 }
  0x1d   : > { %p3132_p7 = pneg %p3131_p6  ;;  %p3138_p13 = por %p3137_p10, %p3136_p4 }
  0x1f   : > { %p3139_p12 = pnand %p3138_p13, %p3132_p7 }
  0x21   : > { %3142 = shalt.err (!%p3139_p12)
}
  0x22   : > { %3021 = dma.hbm_to_vmem [thread:$0]  (!%p3368_p0), %s169_s6, 32, %s172_s8, %s161_s10  }
  0x23   : > { %p3386_p5 = pnand %p2700_p1, %p207_p2  ;;  %s3009_s23 = smul.u32 2112, %s3359_s28 }
  0x24   : > { %s3010_s29 = smul.u32 33792, %s3251_s16  ;;  %s187_s18 = scalar_lea.sflag [#allocation6], %s3359_s28 }
  0x25   : > { %s190_s7 = scalar_lea.vmem [#allocation5], %s3009_s23  ;;  %s3258_s6 = smov [#allocation5]  }
  0x26   : > { %s198_s5 = scalar_lea.hbm %s3836_s2, %s3010_s29  ;;  %s199_s11 = sshll.u32 %s190_s7, 4  ;;  %s200_s11 = int_to_ptr.vmem [resolvable:$true] %s199_s11 }
  0x27   : > { %s3156_s19 = scalar_lea.vmem %s200_s11, 33792  ;;  %s3161_s8 = sshll.u32 %s3258_s6, 4  ;;  %s3162_s8 = int_to_ptr.vmem [resolvable:$false] %s3161_s8 }
  0x28   : > { %p3157_p12 = scmp.ne.s32.totalorder %s200_s11, %s3156_s19  ;;  %s3163_s10 = scalar_lea.vmem %s3162_s8, 67584 }
  0x29   : > { %p3164_p1 = scmp.lt.s32.totalorder %s200_s11, %s3162_s8  ;;  %p3165_p2 = scmp.lt.s32.totalorder %s3163_s10, %s3156_s19 }
  0x2a   : > { %p3159_p6 = pnand %p3157_p12, %p3117_p3 }
  0x2b   : > { %p3166_p4 = por %p3165_p2, %p3164_p1 }
  0x2c   : > { %p3160_p7 = pneg %p3159_p6 }
  0x2e   : > { %p3167_p10 = pnand %p3166_p4, %p3160_p7 }
  0x30   : > { %3170 = shalt.err (!%p3167_p10)
}
  0x31   : > { %s3259_s21 = smov 512   ;;  %s3260_s23 = smov 32  }
  0x32   : > { %3024 = dma.hbm_to_vmem [thread:$0]  (!%p3368_p0), %s198_s5, 33792, %s200_s11, %s187_s18, %s3259_s21, %s3259_s21, %s3260_s23  }
  0x33   : > { %211 = sbr.rel (%p3386_p5) target bundleno = 1282 (0x502), region = 32  ;;  %s3404_s28 = sand.u32 (!%p3386_p5), 1, %s3239_s13  }
  0x34   : > { %s2701_s29 = sshll.u32 (!%p3386_p5), %s3404_s28, 1  ;;  %s214_s30 = scalar_lea.sflag (!%p3386_p5), [#allocation3], %s3404_s28 }
  0x35   : > { %s3408_s4 = scalar_lea.vmem (!%p3386_p5), [#allocation2], %s2701_s29 }
  0x38   : > { %3222 = dma.done.wait (%p3341_p8), %s214_s30, 32  }
  0x39   : > { %3224 = vsyncadd (%p3341_p8), %s214_s30, 4294967264  ;;  %s3011_s9 = smul.u32 2112, %s3404_s28  ;;  %s223_s22 = scalar_lea.sflag [#allocation6], %s3404_s28 }
  0x3b   : > { %s3416_s5 = scalar_lea.vmem [#allocation5], %s3011_s9 }
  0x3c   : > { %3226 = dma.done.wait (%p3341_p8), %s223_s22, 33792  }
  0x3d   : > { %3228 = vsyncadd (%p3341_p8), %s223_s22, 4294933504  ;;  %p259_p0 = scmp.lt.s32.totalorder %s3247_s15, 1  ;;  %v3261_v0 = vmov 0.0   ;;  %vm3262_vm0 = vmmov 0   ;;  %v3428_v9 = vld [vmem:[%s3408_s4] sm:$0x3] }
  0x3e   : > { %2990 = vmatprep.subr.mxu0 %v3261_v0  ;;  %3006 = vmatprep.mubr.msk.f32.mxu0 %vm3262_vm0, %v3261_v0  ;;  %vm276_vm1 = vcmask 523264   ;;  %vm350_vm2 = vcmask 58368   ;;  %v3263_v18 = vmov 7   ;;  %v3264_v19 = vmov 3   ;;  %v487_v26 = vld [vmem:[%s3416_s5 + $0x1c0] sm:$0xff]  ;;  %s3270_s24 = smov 64  }
  0x3f   : > { %s260_s7 = scalar_select %p259_p0, %s3247_s15, 1  ;;  %3095 = vset.pattern.permute.xlu0 %v3263_v18  ;;  %3093 = vset.pattern.permute.xlu1 %v3264_v19  ;;  %v3265_v23 = vmov 1   ;;  %v3266_v24 = vmov 5   ;;  %v3267_v25 = vmov 2   ;;  %v491_v27 = vld [vmem:[%s3416_s5 + $0x1e0] sm:$0xff]  ;;  %v3268_v29 = vmov 0  }
  0x40   : > { %v479_v28 = vld [vmem:[%s3416_s5 + $0x180] sm:$0xff]  ;;  %v2763_v30 = vcombine.high %v487_v26, %v491_v27  ;;  %v2762_v31 = vcombine.low %v487_v26, %v491_v27  ;;  %v3269_v44 = vmov 6   ;;  %vm424_vm3 = vcmask 64512   ;;  %s2702_s8 = sshll.u32 %s3404_s28, 4  ;;  %s2980_s21 = sshll.u32 %s3247_s15, 8 }
  0x41   : > { %s2979_s11 = sshll.u32 %s260_s7, 6  ;;  %v483_v32 = vld [vmem:[%s3416_s5 + $0x1a0] sm:$0xff]  ;;  %vm2015_vm4 = vcmask 130048   ;;  %s3789_s10 = scalar_lea.vmem [#allocation7], %s2702_s8 }
  0x42   : > { %s263_s6 = scalar_lea.vmem %s3835_s1, %s2979_s11  ;;  %v2755_v33 = vcombine.high %v479_v28, %v483_v32  ;;  %v471_v34 = vld [vmem:[%s3416_s5 + $0x140] sm:$0xff]  ;;  %2019 = vmatprep.subr.bf16.mxu1 %v2763_v30  ;;  %v2754_v36 = vcombine.low %v479_v28, %v483_v32  ;;  %s2574_s23 = sshll.u32 %s3789_s10, 4  ;;  %s2575_s23 = int_to_ptr.vmem [resolvable:$true] %s2574_s23 }
  0x43   : > { %v275_v1 = vld [vmem:[%s263_s6 + $0x38] sm:$0xff]  ;;  %v274_v2 = vld [vmem:[%s263_s6 + $0x30] sm:$0xff]  ;;  %v273_v3 = vld [vmem:[%s263_s6 + $0x28] sm:$0xff]  ;;  %2020 = vmatpush1.bf16.msra.mxu1 %v2762_v31  ;;  %s2572_s4 = scalar_lea.hbm %s3837_s3, %s2980_s21  ;;  %s2558_s9 = scalar_lea.sflag [#allocation4], %s3404_s28 }
  0x44   : > { %2991 = vmatpush3.msra.mxu0 %v275_v1  ;;  %v272_v4 = vld [vmem:[%s263_s6 + $0x20] sm:$0xff]  ;;  %v271_v5 = vld [vmem:[%s263_s6 + $0x18] sm:$0xff]  ;;  %v270_v6 = vld [vmem:[%s263_s6 + $0x10] sm:$0xff]  ;;  %2021 = vmatprep.subr.bf16.mxu1 %v2755_v33  ;;  %s3171_s22 = scalar_lea.vmem %s2575_s23, 256 }
  0x45   : > { %2992 = vmatprep.subr.mxu0 %v3261_v0  ;;  %v269_v7 = vld [vmem:[%s263_s6 + $0x8] sm:$0xff]  ;;  %v268_v8 = vld [vmem:[%s263_s6] sm:$0xff]  ;;  %p3172_p8 = scmp.ne.s32.totalorder %s2575_s23, %s3171_s22 }
  0x46   : > { %2993 = vmatpush3.msra.mxu0 %v274_v2  ;;  %v475_v35 = vld [vmem:[%s3416_s5 + $0x160] sm:$0xff] }
  0x47   : > { %2994 = vmatprep.subr.mxu0 %v3261_v0  ;;  %v615_v37 = vld [vmem:[%s3416_s5 + $0x5c0] sm:$0xff]  ;;  %v2747_v39 = vcombine.high %v471_v34, %v475_v35  ;;  %2022 = vmatpush1.bf16.msra.mxu1 %v2754_v36  ;;  %v2746_v50 = vcombine.low %v471_v34, %v475_v35  ;;  %p3173_p3 = pnand %p3172_p8, %p3345_p9 }
  0x48   : > { %2995 = vmatpush3.msra.mxu0 %v273_v3  ;;  %v619_v38 = vld [vmem:[%s3416_s5 + $0x5e0] sm:$0xff] }
  0x49   : > { %2996 = vmatprep.subr.mxu0 %v3261_v0  ;;  %v2890_v40 = vcombine.low %v615_v37, %v619_v38  ;;  %v2891_v41 = vcombine.high %v615_v37, %v619_v38  ;;  %v607_v42 = vld [vmem:[%s3416_s5 + $0x580] sm:$0xff]  ;;  %2023 = vmatprep.subr.bf16.mxu1 %v2747_v39  ;;  %p3174_p13 = pneg %p3173_p3 }
  0x4a   : > { %2997 = vmatpush3.msra.mxu0 %v272_v4  ;;  %v611_v43 = vld [vmem:[%s3416_s5 + $0x5a0] sm:$0xff] }
  0x4b   : > { %2998 = vmatprep.subr.mxu0 %v3261_v0  ;;  %v463_v45 = vld [vmem:[%s3416_s5 + $0x100] sm:$0xff]  ;;  %v2883_v47 = vcombine.high %v607_v42, %v611_v43  ;;  %v2882_v51 = vcombine.low %v607_v42, %v611_v43  ;;  %2024 = vmatpush1.bf16.msra.mxu1 %v2746_v50 }
  0x4c   : > { %2999 = vmatpush3.msra.mxu0 %v271_v5  ;;  %v467_v46 = vld [vmem:[%s3416_s5 + $0x120] sm:$0xff] }
  0x4d   : > { %3000 = vmatprep.subr.mxu0 %v3261_v0  ;;  %v599_v48 = vld [vmem:[%s3416_s5 + $0x540] sm:$0xff]  ;;  %v2739_v52 = vcombine.high %v463_v45, %v467_v46  ;;  %v2738_v58 = vcombine.low %v463_v45, %v467_v46 }
  0x4e   : > { %3001 = vmatpush3.msra.mxu0 %v270_v6  ;;  %v603_v49 = vld [vmem:[%s3416_s5 + $0x560] sm:$0xff] }
  0x4f   : > { %3002 = vmatprep.subr.mxu0 %v3261_v0  ;;  %v455_v53 = vld [vmem:[%s3416_s5 + $0xc0] sm:$0xff]  ;;  %v2875_v54 = vcombine.high %v599_v48, %v603_v49  ;;  %v2874_v59 = vcombine.low %v599_v48, %v603_v49  ;;  %2025 = vmatprep.subr.bf16.mxu1 %v2739_v52 }
  0x50   : > { %3003 = vmatpush3.msra.mxu0 %v269_v7  ;;  %v459_v55 = vld [vmem:[%s3416_s5 + $0xe0] sm:$0xff]  ;;  %2026 = vmatpush1.bf16.msra.mxu1 %v2738_v58 }
  0x51   : > { %3004 = vmatprep.subr.mxu0 %v3261_v0  ;;  %v591_v56 = vld [vmem:[%s3416_s5 + $0x500] sm:$0xff]  ;;  %v2731_v60 = vcombine.high %v455_v53, %v459_v55  ;;  %v2730_v2 = vcombine.low %v455_v53, %v459_v55 }
  0x52   : > { %3005 = vmatpush3.msra.mxu0 %v268_v8  ;;  %v595_v57 = vld [vmem:[%s3416_s5 + $0x520] sm:$0xff] }
  0x53   : > { %3007 = vmatmul.mubr.msk.f32.vlgmr.msra.gmra.mxu0 %vm276_vm1, %v3428_v9  ;;  %2060 = vmatprep.subr.bf16.mxu0 %v2891_v41  ;;  %v447_v61 = vld [vmem:[%s3416_s5 + $0x80] sm:$0xff]  ;;  %v2867_v62 = vcombine.high %v591_v56, %v595_v57  ;;  %v2866_v3 = vcombine.low %v591_v56, %v595_v57 }
  0x54   : > { %2061 = vmatpush1.bf16.msra.mxu0 %v2890_v40  ;;  %v451_v63 = vld [vmem:[%s3416_s5 + $0xa0] sm:$0xff]  ;;  %2027 = vmatprep.subr.bf16.mxu1 %v2731_v60 }
  0x55   : > { %2062 = vmatprep.subr.bf16.mxu0 %v2883_v47  ;;  %v583_v0 = vld [vmem:[%s3416_s5 + $0x4c0] sm:$0xff]  ;;  %v2723_v4 = vcombine.high %v447_v61, %v451_v63  ;;  %2028 = vmatpush1.bf16.msra.mxu1 %v2730_v2 }
  0x56   : > { %v587_v1 = vld [vmem:[%s3416_s5 + $0x4e0] sm:$0xff] }
  0x57   : > { %v439_v5 = vld [vmem:[%s3416_s5 + $0x40] sm:$0xff]  ;;  %v2859_v6 = vcombine.high %v583_v0, %v587_v1  ;;  %2029 = vmatprep.subr.bf16.mxu1 %v2723_v4 }
  0x58   : > { %2063 = vmatpush1.bf16.msra.mxu0 %v2882_v51  ;;  %v443_v7 = vld [vmem:[%s3416_s5 + $0x60] sm:$0xff] }
  0x59   : > { %2064 = vmatprep.subr.bf16.mxu0 %v2875_v54  ;;  %v575_v8 = vld [vmem:[%s3416_s5 + $0x480] sm:$0xff]  ;;  %v2714_v19 = vcombine.low %v439_v5, %v443_v7 }
  0x5a   : > { %v571_v18 = vld [vmem:[%s3416_s5 + $0x460] sm:$0xff] }
  0x5b   : > { %v559_v26 = vld [vmem:[%s3416_s5 + $0x400] sm:$0xff] }
  0x5c   : > { %2065 = vmatpush1.bf16.msra.mxu0 %v2874_v59  ;;  %v563_v27 = vld [vmem:[%s3416_s5 + $0x420] sm:$0xff] }
  0x5d   : > { %2066 = vmatprep.subr.bf16.mxu0 %v2867_v62  ;;  %v543_v32 = vld [vmem:[%s3416_s5 + $0x380] sm:$0xff]  ;;  %v2835_v33 = vcombine.high %v559_v26, %v563_v27  ;;  %v2834_v38 = vcombine.low %v559_v26, %v563_v27 }
  0x5e   : > { %v547_v34 = vld [vmem:[%s3416_s5 + $0x3a0] sm:$0xff] }
  0x5f   : > { %v679_v35 = vld [vmem:[%s3416_s5 + $0x7c0] sm:$0xff]  ;;  %v2819_v39 = vcombine.high %v543_v32, %v547_v34  ;;  %v2818_v45 = vcombine.low %v543_v32, %v547_v34 }
  0x60   : > { %2067 = vmatpush1.bf16.msra.mxu0 %v2866_v3  ;;  %v683_v36 = vld [vmem:[%s3416_s5 + $0x7e0] sm:$0xff] }
  0x61   : > { %2068 = vmatprep.subr.bf16.mxu0 %v2859_v6  ;;  %v535_v40 = vld [vmem:[%s3416_s5 + $0x340] sm:$0xff]  ;;  %v2955_v41 = vcombine.high %v679_v35, %v683_v36  ;;  %v2954_v46 = vcombine.low %v679_v35, %v683_v36 }
  0x62   : > { %v539_v42 = vld [vmem:[%s3416_s5 + $0x360] sm:$0xff] }
  0x63   : > { %v671_v43 = vld [vmem:[%s3416_s5 + $0x780] sm:$0xff]  ;;  %v2811_v47 = vcombine.high %v535_v40, %v539_v42  ;;  %v2810_v51 = vcombine.low %v535_v40, %v539_v42  ;;  %v3271_v42 = vmov 4  }
  0x64   : > { %v527_v49 = vld [vmem:[%s3416_s5 + $0x300] sm:$0xff] }
  0x65   : > { %v531_v50 = vld [vmem:[%s3416_s5 + $0x320] sm:$0xff] }
  0x66   : > { %v2803_v53 = vcombine.high %v527_v49, %v531_v50  ;;  %v519_v54 = vld [vmem:[%s3416_s5 + $0x2c0] sm:$0xff]  ;;  %v2802_v56 = vcombine.low %v527_v49, %v531_v50  ;;  %v3523_v49 = vld [vmem:[%s3416_s5 + $0x5c8] sm:$0xff] }
  0x67   : > { %v523_v55 = vld [vmem:[%s3416_s5 + $0x2e0] sm:$0xff]  ;;  %v3526_v50 = vld [vmem:[%s3416_s5 + $0x5e8] sm:$0xff] }
  0x68   : > { %v2795_v57 = vcombine.high %v519_v54, %v523_v55  ;;  %v511_v58 = vld [vmem:[%s3416_s5 + $0x280] sm:$0xff]  ;;  %v2794_v60 = vcombine.low %v519_v54, %v523_v55 }
  0x69   : > { %v515_v59 = vld [vmem:[%s3416_s5 + $0x2a0] sm:$0xff] }
  0x6a   : > { %v503_v62 = vld [vmem:[%s3416_s5 + $0x240] sm:$0xff] }
  0x6b   : > { %v495_v3 = vld [vmem:[%s3416_s5 + $0x200] sm:$0xff] }
  0x6c   : > { %v499_v4 = vld [vmem:[%s3416_s5 + $0x220] sm:$0xff] }
  0x6d   : > { %v663_v6 = vld [vmem:[%s3416_s5 + $0x740] sm:$0xff] }
  0x6e   : > { %v643_v32 = vld [vmem:[%s3416_s5 + $0x6a0] sm:$0xff] }
  0x6f   : > { %v631_v36 = vld [vmem:[%s3416_s5 + $0x640] sm:$0xff] }
 0x113   : > { %v346_v10 = vpop.f32.mrf.mxu0 }
 0x114   : > { %v351_v11 = vsel %vm350_vm2, %v346_v10, -inf }
 0x115   : > { %352 = vmax.xlane.f32.xlu0 %v351_v11  ;;  %v3008_v12 = vpop.f32.mrf.mxu0  ;;  %v2722_v11 = vcombine.low %v447_v61, %v451_v63  ;;  %v2787_v61 = vcombine.high %v511_v58, %v515_v59  ;;  %v507_v63 = vld [vmem:[%s3416_s5 + $0x260] sm:$0xff] }
 0x116   : > { %v2858_v12 = vcombine.low %v583_v0, %v587_v1  ;;  %v2786_v0 = vcombine.low %v511_v58, %v515_v59  ;;  %v2779_v1 = vcombine.high %v503_v62, %v507_v63  ;;  %v2778_v2 = vcombine.low %v503_v62, %v507_v63 }
 0x117   : > { %2030 = vmatpush1.bf16.msra.mxu1 %v2722_v11 }
 0x118   : > { %2069 = vmatpush1.bf16.msra.mxu0 %v2858_v12 }
 0x19e   : > { %v353_v13 = vpop.xlane.xlu0 %352 }
 0x19f   : > { %v354_v14 = vsub.f32 %v346_v10, %v353_v13  ;;  %v579_v10 = vld [vmem:[%s3416_s5 + $0x4a0] sm:$0xff]  ;;  %v2715_v13 = vcombine.high %v439_v5, %v443_v7  ;;  %v2771_v5 = vcombine.high %v495_v3, %v499_v4 }
 0x1a0   : > { %v667_v7 = vld [vmem:[%s3416_s5 + $0x760] sm:$0xff] }
 0x1a1   : > { %v355_v15 = vmul.f32 1.442695, %v354_v14  ;;  %v431_v14 = vld [vmem:[%s3416_s5] sm:$0xff]  ;;  %2031 = vmatprep.subr.bf16.mxu1 %v2715_v13  ;;  %v2938_v11 = vcombine.low %v663_v6, %v667_v7 }
 0x1a2   : > { %2032 = vmatpush1.bf16.msra.mxu1 %v2714_v19  ;;  %v655_v13 = vld [vmem:[%s3416_s5 + $0x700] sm:$0xff] }
 0x1a3   : > { %3111 = vpow2.f32 %v355_v15  ;;  %v2851_v15 = vcombine.high %v575_v8, %v579_v10 }
 0x1a5   : > { %2070 = vmatprep.subr.bf16.mxu0 %v2851_v15 }
 0x1b0   : > { %v3112_v16 = vpop.eup %3111 }
 0x1b1   : > { %v357_v17 = vsel %vm350_vm2, %v3112_v16, 0.0 }
 0x1b2   : > { %358 = vadd.xlane.f32.xlu0 %v357_v17  ;;  %v567_v17 = vld [vmem:[%s3416_s5 + $0x440] sm:$0xff] }
 0x1b3   : > { %v2842_v30 = vcombine.low %v567_v17, %v571_v18 }
 0x23b   : > { %v359_v20 = vpop.xlane.xlu0 %358 }
 0x23c   : > { %3113 = vrcp.f32 %v359_v20  ;;  %v2850_v20 = vcombine.low %v575_v8, %v579_v10  ;;  %v2770_v8 = vcombine.low %v495_v3, %v499_v4  ;;  %v2939_v10 = vcombine.high %v663_v6, %v667_v7  ;;  %v484_v6 = vld [vmem:[%s3416_s5 + $0x1a8] sm:$0xff] }
 0x23e   : > { %2071 = vmatpush1.bf16.msra.mxu0 %v2850_v20 }
 0x249   : > { %v3114_v21 = vpop.eup %3113 }
 0x24a   : > { %v3432_v22 = vmul.f32 %v3114_v21, %v3112_v16  ;;  %v435_v16 = vld [vmem:[%s3416_s5 + $0x20] sm:$0xff] }
 0x24b   : > { %v2707_v21 = vcombine.high %v431_v14, %v435_v16  ;;  %v2706_v28 = vcombine.low %v431_v14, %v435_v16  ;;  %v659_v14 = vld [vmem:[%s3416_s5 + $0x720] sm:$0xff] }
 0x24c   : > { %399 = vperm.xlu0 %3095, %v3432_v22   ;;  %379 = vperm.xlu1 %3093, %v3432_v22   ;;  %v2931_v15 = vcombine.high %v655_v13, %v659_v14  ;;  %v2930_v16 = vcombine.low %v655_v13, %v659_v14  ;;  %v403_v3 = vsub.f32 0.0, %v3432_v22 }
 0x24d   : > { %2033 = vmatprep.subr.bf16.mxu1 %v2707_v21  ;;  %v647_v21 = vld [vmem:[%s3416_s5 + $0x6c0] sm:$0xff] }
 0x24e   : > { %2034 = vmatpush1.bf16.msra.mxu1 %v2706_v28  ;;  %v425_v4 = vsel %vm424_vm3, %v403_v3, 0.0  ;;  %v580_v3 = vld [vmem:[%s3416_s5 + $0x4a8] sm:$0xff] }
 0x250   : > { %3094 = vset.pattern.permute.xlu1 %v3265_v23  ;;  %v551_v23 = vld [vmem:[%s3416_s5 + $0x3c0] sm:$0xff] }
 0x251   : > { %369 = vperm.xlu1 %3094, %v3432_v22  }
 0x255   : > { %3096 = vset.pattern.permute.xlu1 %v3266_v24  ;;  %v2843_v24 = vcombine.high %v567_v17, %v571_v18  ;;  %v3498_v17 = vld [vmem:[%s3416_s5 + $0x800] sm:$0xff] }
 0x256   : > { %389 = vperm.xlu1 %3096, %v3432_v22   ;;  %v3501_v18 = vld [vmem:[%s3416_s5 + $0x820] sm:$0xff] }
 0x257   : > { %2072 = vmatprep.subr.bf16.mxu0 %v2843_v24  ;;  %v2962_v19 = vcombine.low %v3498_v17, %v3501_v18  ;;  %v2963_v20 = vcombine.high %v3498_v17, %v3501_v18  ;;  %v468_v17 = vld [vmem:[%s3416_s5 + $0x128] sm:$0xff] }
 0x258   : > { %2073 = vmatpush1.bf16.msra.mxu0 %v2842_v30 }
 0x259   : > { %2074 = vmatprep.subr.bf16.mxu0 %v2835_v33 }
 0x25a   : > { %3097 = vset.pattern.permute.xlu1 %v3267_v25  ;;  %v555_v25 = vld [vmem:[%s3416_s5 + $0x3e0] sm:$0xff] }
 0x25b   : > { %374 = vperm.xlu1 %3097, %v3432_v22   ;;  %v2827_v31 = vcombine.high %v551_v23, %v555_v25  ;;  %v2826_v37 = vcombine.low %v551_v23, %v555_v25  ;;  %v651_v23 = vld [vmem:[%s3416_s5 + $0x6e0] sm:$0xff] }
 0x25c   : > { %2075 = vmatpush1.bf16.msra.mxu0 %v2834_v38  ;;  %v2922_v25 = vcombine.low %v647_v21, %v651_v23  ;;  %v2923_v26 = vcombine.high %v647_v21, %v651_v23  ;;  %v456_v21 = vld [vmem:[%s3416_s5 + $0xc8] sm:$0xff] }
 0x25d   : > { %2035 = vmatprep.subr.bf16.mxu1 %v2827_v31  ;;  %2076 = vmatprep.subr.bf16.mxu0 %v2955_v41  ;;  %v639_v31 = vld [vmem:[%s3416_s5 + $0x680] sm:$0xff]  ;;  %v460_v23 = vld [vmem:[%s3416_s5 + $0xe8] sm:$0xff] }
 0x25e   : > { %2036 = vmatpush2.bf16.msra.mxu1 %v2826_v37  ;;  %v2915_v33 = vcombine.high %v639_v31, %v643_v32  ;;  %v2914_v34 = vcombine.low %v639_v31, %v643_v32  ;;  %v635_v37 = vld [vmem:[%s3416_s5 + $0x660] sm:$0xff]  ;;  %v612_v31 = vld [vmem:[%s3416_s5 + $0x5a8] sm:$0xff] }
 0x25f   : > { %3098 = vset.pattern.permute.xlu1 %v3268_v29  ;;  %2037 = vmatprep.subr.bf16.mxu1 %v2819_v39  ;;  %v2907_v38 = vcombine.high %v631_v36, %v635_v37  ;;  %v2906_v40 = vcombine.low %v631_v36, %v635_v37  ;;  %v452_v37 = vld [vmem:[%s3416_s5 + $0xa8] sm:$0xff] }
 0x260   : > { %364 = vperm.xlu1 %3098, %v3432_v22   ;;  %2077 = vmatpush2.bf16.msra.mxu0 %v2954_v46 }
 0x262   : > { %2038 = vmatpush2.bf16.msra.mxu1 %v2818_v45 }
 0x263   : > { %2039 = vmatprep.subr.bf16.mxu1 %v2811_v47 }
 0x264   : > { %3104 = vset.pattern.permute.xlu1 %v3269_v44  ;;  %v675_v44 = vld [vmem:[%s3416_s5 + $0x7a0] sm:$0xff] }
 0x265   : > { %v2947_v48 = vcombine.high %v671_v43, %v675_v44  ;;  %v2946_v52 = vcombine.low %v671_v43, %v675_v44  ;;  %v623_v43 = vld [vmem:[%s3416_s5 + $0x600] sm:$0xff] }
 0x266   : > { %2040 = vmatpush2.bf16.msra.mxu1 %v2810_v51  ;;  %v627_v44 = vld [vmem:[%s3416_s5 + $0x620] sm:$0xff]  ;;  %v2893_v51 = vcombine.high %v3523_v49, %v3526_v50 }
 0x267   : > { %2078 = vmatprep.subr.bf16.mxu0 %v2947_v48  ;;  %2041 = vmatprep.subr.bf16.mxu1 %v2803_v53  ;;  %v2899_v46 = vcombine.high %v623_v43, %v627_v44  ;;  %v2898_v47 = vcombine.low %v623_v43, %v627_v44  ;;  %v440_v44 = vld [vmem:[%s3416_s5 + $0x48] sm:$0xff] }
 0x268   : > { %2079 = vmatpush2.bf16.msra.mxu0 %v2946_v52  ;;  %v2892_v52 = vcombine.low %v3523_v49, %v3526_v50  ;;  %v432_v50 = vld [vmem:[%s3416_s5 + $0x8] sm:$0xff] }
 0x269   : > { %2080 = vmatprep.subr.bf16.mxu0 %v2939_v10  ;;  %v3552_v10 = vpack.c.bf16 %v425_v4, %v425_v4 }
 0x26a   : > { %2042 = vmatpush2.bf16.msra.mxu1 %v2802_v56 }
 0x26b   : > { %2043 = vmatprep.subr.bf16.mxu1 %v2795_v57 }
 0x26c   : > { %2081 = vmatpush2.bf16.msra.mxu0 %v2938_v11  ;;  %v472_v11 = vld [vmem:[%s3416_s5 + $0x148] sm:$0xff] }
 0x26d   : > { %2082 = vmatprep.subr.bf16.mxu0 %v2931_v15 }
 0x26e   : > { %2044 = vmatpush2.bf16.msra.mxu1 %v2794_v60  ;;  %v488_v60 = vld [vmem:[%s3416_s5 + $0x1c8] sm:$0xff] }
 0x26f   : > { %2045 = vmatprep.subr.bf16.mxu1 %v2787_v61  ;;  %v492_v61 = vld [vmem:[%s3416_s5 + $0x1e8] sm:$0xff] }
 0x270   : > { %2083 = vmatpush2.bf16.msra.mxu0 %v2930_v16  ;;  %v2764_v7 = vcombine.low %v488_v60, %v492_v61  ;;  %v464_v16 = vld [vmem:[%s3416_s5 + $0x108] sm:$0xff] }
 0x271   : > { %2084 = vmatprep.subr.bf16.mxu0 %v2923_v26 }
 0x272   : > { %2046 = vmatpush2.bf16.msra.mxu1 %v2786_v0 }
 0x273   : > { %2047 = vmatprep.subr.bf16.mxu1 %v2779_v1 }
 0x274   : > { %2085 = vmatpush2.bf16.msra.mxu0 %v2922_v25 }
 0x275   : > { %2086 = vmatprep.subr.bf16.mxu0 %v2915_v33 }
 0x276   : > { %2048 = vmatpush2.bf16.msra.mxu1 %v2778_v2  ;;  %v2765_v2 = vcombine.high %v488_v60, %v492_v61  ;;  %v552_v60 = vld [vmem:[%s3416_s5 + $0x3c8] sm:$0xff] }
 0x277   : > { %2049 = vmatprep.subr.bf16.mxu1 %v2771_v5  ;;  %v480_v5 = vld [vmem:[%s3416_s5 + $0x188] sm:$0xff] }
 0x278   : > { %2087 = vmatpush2.bf16.msra.mxu0 %v2914_v34  ;;  %v2756_v13 = vcombine.low %v480_v5, %v484_v6  ;;  %v2733_v34 = vcombine.high %v456_v21, %v460_v23  ;;  %v556_v61 = vld [vmem:[%s3416_s5 + $0x3e8] sm:$0xff] }
 0x279   : > { %2088 = vmatprep.subr.bf16.mxu0 %v2907_v38  ;;  %v2829_v4 = vcombine.high %v552_v60, %v556_v61 }
 0x27a   : > { %2050 = vmatpush2.bf16.msra.mxu1 %v2770_v8 }
 0x27b   : > { %2115 = vmatprep.subr.bf16.mxu1 %v2963_v20 }
 0x27c   : > { %2089 = vmatpush2.bf16.msra.mxu0 %v2906_v40  ;;  %v600_v40 = vld [vmem:[%s3416_s5 + $0x548] sm:$0xff] }
 0x27d   : > { %2090 = vmatprep.subr.bf16.mxu0 %v2899_v46 }
 0x280   : > { %2091 = vmatpush2.bf16.msra.mxu0 %v2898_v47 }
 0x281   : > { %2183 = vmatprep.subr.bf16.mxu0 %v2893_v51  ;;  %v596_v51 = vld [vmem:[%s3416_s5 + $0x528] sm:$0xff] }
 0x2c7   : > { %v380_v12 = vpop.permute.xlu1 %379  ;;  %v400_v39 = vpop.permute.xlu0 %399 }
 0x2c8   : > { %v382_v27 = vmul.f32 %v380_v12, %v3428_v9  ;;  %v402_v45 = vmul.f32 %v400_v39, %v3428_v9  ;;  %v476_v12 = vld [vmem:[%s3416_s5 + $0x168] sm:$0xff]  ;;  %v2732_v39 = vcombine.low %v456_v21, %v460_v23 }
 0x2c9   : > { %v2749_v14 = vcombine.high %v472_v11, %v476_v12  ;;  %v2748_v18 = vcombine.low %v472_v11, %v476_v12  ;;  %v568_v11 = vld [vmem:[%s3416_s5 + $0x448] sm:$0xff] }
 0x2ca   : > { %v572_v12 = vld [vmem:[%s3416_s5 + $0x468] sm:$0xff] }
 0x2cb   : > { %v2844_v23 = vcombine.low %v568_v11, %v572_v12 }
 0x2cc   : > { %v370_v24 = vpop.permute.xlu1 %369 }
 0x2cd   : > { %v372_v28 = vmul.f32 %v370_v24, %v3428_v9 }
 0x2cf   : > { %v3099_v30 = vpack.i.bf16 %v372_v28, %v382_v27  ;;  %v2740_v28 = vcombine.low %v464_v16, %v468_v17 }
 0x2d1   : > { %3100 = vrot.lane.b32.xlu1 %v3099_v30, %s3270_s24  ;;  %v390_v35 = vpop.permute.xlu1 %389  ;;  %v608_v30 = vld [vmem:[%s3416_s5 + $0x588] sm:$0xff] }
 0x2d2   : > { %v392_v41 = vmul.f32 %v390_v35, %v3428_v9  ;;  %v2885_v38 = vcombine.high %v608_v30, %v612_v31  ;;  %v2884_v43 = vcombine.low %v608_v30, %v612_v31  ;;  %v684_v30 = vld [vmem:[%s3416_s5 + $0x7e8] sm:$0xff] }
 0x2d4   : > { %v3106_v48 = vpack.i.bf16 %v392_v41, %v402_v45  ;;  %v604_v41 = vld [vmem:[%s3416_s5 + $0x568] sm:$0xff] }
 0x2d5   : > { %394 = vperm.xlu1 %3104, %v3432_v22   ;;  %v444_v45 = vld [vmem:[%s3416_s5 + $0x68] sm:$0xff]  ;;  %v2877_v46 = vcombine.high %v600_v40, %v604_v41  ;;  %v2876_v49 = vcombine.low %v600_v40, %v604_v41 }
 0x2d6   : > { %v375_v53 = vpop.permute.xlu1 %374 }
 0x2d7   : > { %v377_v56 = vmul.f32 %v375_v53, %v3428_v9  ;;  %v2717_v53 = vcombine.high %v440_v44, %v444_v45 }
 0x2d9   : > { %3105 = vset.pattern.permute.xlu1 %v3271_v42 }
 0x2da   : > { %384 = vperm.xlu1 %3105, %v3432_v22   ;;  %v2757_v22 = vcombine.high %v480_v5, %v484_v6  ;;  %v544_v6 = vld [vmem:[%s3416_s5 + $0x388] sm:$0xff] }
 0x2db   : > { %v365_v54 = vpop.permute.xlu1 %364 }
 0x2dc   : > { %v367_v57 = vmul.f32 %v365_v54, %v3428_v9 }
 0x2de   : > { %3107 = vrot.lane.b32.xlu1 %v3106_v48, %s3270_s24  ;;  %v592_v48 = vld [vmem:[%s3416_s5 + $0x508] sm:$0xff] }
 0x2df   : > { %v2869_v54 = vcombine.high %v592_v48, %v596_v51 }
 0x343   : > { %v3101_v55 = vpop.permute.xlu1 %3100 }
 0x344   : > { %v3103_v58 = vunpack.i.h.bf16 %v3101_v55  ;;  %v3102_v59 = vunpack.i.l.bf16 %v3101_v55  ;;  %v2716_v55 = vcombine.low %v440_v44, %v444_v45 }
 0x346   : > { %v420_v62 = vsel %vm276_vm1, %v367_v57, %v3103_v58  ;;  %v421_v63 = vsel %vm276_vm1, %v377_v56, %v3102_v59  ;;  %v584_v56 = vld [vmem:[%s3416_s5 + $0x4c8] sm:$0xff]  ;;  %v2868_v59 = vcombine.low %v592_v48, %v596_v51 }
 0x347   : > { %v3539_v0 = vpack.c.bf16 %v420_v62, %v420_v62  ;;  %v3541_v1 = vpack.c.bf16 %v421_v63, %v421_v63  ;;  %v588_v57 = vld [vmem:[%s3416_s5 + $0x4e8] sm:$0xff] }
 0x348   : > { %v2861_v62 = vcombine.high %v584_v56, %v588_v57  ;;  %v2860_v5 = vcombine.low %v584_v56, %v588_v57 }
 0x349   : > { %2051 = vmatprep.mubr.bf16.mxu1 %v3541_v1 }
 0x34a   : > { %2052 = vmatmul.mubr.bf16.vlgmr.msra.gmra.mxu1 %v3539_v0 }
 0x34b   : > { %2116 = vmatpush1.bf16.msra.mxu1 %v2962_v19  ;;  %2133 = vmatprep.mubr.bf16.mxu1 %v3268_v29  ;;  %v2741_v19 = vcombine.high %v464_v16, %v468_v17  ;;  %v540_v16 = vld [vmem:[%s3416_s5 + $0x368] sm:$0xff]  ;;  %v2845_v17 = vcombine.high %v568_v11, %v572_v12 }
 0x34c   : > { %2142 = vmatprep.subr.bf16.mxu1 %v2765_v2  ;;  %v576_v2 = vld [vmem:[%s3416_s5 + $0x488] sm:$0xff] }
 0x350   : > { %v395_v8 = vpop.permute.xlu1 %394 }
 0x351   : > { %v397_v24 = vmul.f32 %v395_v8, %v3428_v9  ;;  %v2853_v8 = vcombine.high %v576_v2, %v580_v3 }
 0x352   : > { %2970 = vmatmul.mubr.msk.bf16.vlgmr.msra.gmra.mxu1 %vm2015_vm4, %v3552_v10 }
 0x353   : > { %2143 = vmatpush1.bf16.msra.mxu1 %v2764_v7  ;;  %2174 = vmatprep.mubr.bf16.mxu1 %v3541_v1  ;;  %v548_v7 = vld [vmem:[%s3416_s5 + $0x3a8] sm:$0xff] }
 0x354   : > { %2144 = vmatprep.subr.bf16.mxu1 %v2757_v22  ;;  %v2828_v22 = vcombine.low %v552_v60, %v556_v61 }
 0x355   : > { %v385_v15 = vpop.permute.xlu1 %384 }
 0x356   : > { %v387_v25 = vmul.f32 %v385_v15, %v3428_v9  ;;  %v448_v9 = vld [vmem:[%s3416_s5 + $0x88] sm:$0xff] }
 0x357   : > { %2145 = vmatpush1.bf16.msra.mxu1 %v2756_v13  ;;  %v2725_v42 = vcombine.high %v448_v9, %v452_v37  ;;  %v2724_v47 = vcombine.low %v448_v9, %v452_v37  ;;  %v2821_v13 = vcombine.high %v544_v6, %v548_v7  ;;  %v536_v15 = vld [vmem:[%s3416_s5 + $0x348] sm:$0xff] }
 0x358   : > { %2146 = vmatprep.subr.bf16.mxu1 %v2749_v14  ;;  %v2852_v14 = vcombine.low %v576_v2, %v580_v3  ;;  %v2813_v21 = vcombine.high %v536_v15, %v540_v16 }
 0x359   : > { %v3108_v20 = vpop.permute.xlu1 %3107 }
 0x35a   : > { %v3110_v26 = vunpack.i.h.bf16 %v3108_v20  ;;  %v3109_v27 = vunpack.i.l.bf16 %v3108_v20  ;;  %v564_v20 = vld [vmem:[%s3416_s5 + $0x428] sm:$0xff] }
 0x35b   : > { %2147 = vmatpush1.bf16.msra.mxu1 %v2748_v18  ;;  %v2820_v18 = vcombine.low %v544_v6, %v548_v7 }
 0x35c   : > { %v422_v32 = vsel %vm276_vm1, %v387_v25, %v3110_v26  ;;  %v423_v33 = vsel %vm276_vm1, %v397_v24, %v3109_v27  ;;  %2148 = vmatprep.subr.bf16.mxu1 %v2741_v19  ;;  %v560_v19 = vld [vmem:[%s3416_s5 + $0x408] sm:$0xff]  ;;  %v2812_v27 = vcombine.low %v536_v15, %v540_v16 }
 0x35d   : > { %v3569_v35 = vpack.c.bf16 %v422_v32, %v422_v32  ;;  %v3571_v36 = vpack.c.bf16 %v423_v33, %v423_v33  ;;  %v528_v24 = vld [vmem:[%s3416_s5 + $0x308] sm:$0xff]  ;;  %v2837_v26 = vcombine.high %v560_v19, %v564_v20  ;;  %v2836_v32 = vcombine.low %v560_v19, %v564_v20 }
 0x35e   : > { %v532_v25 = vld [vmem:[%s3416_s5 + $0x328] sm:$0xff] }
 0x35f   : > { %2149 = vmatpush1.bf16.msra.mxu1 %v2740_v28  ;;  %2092 = vmatprep.mubr.bf16.mxu0 %v3571_v36  ;;  %v680_v28 = vld [vmem:[%s3416_s5 + $0x7c8] sm:$0xff]  ;;  %v2805_v31 = vcombine.high %v528_v24, %v532_v25  ;;  %v2804_v37 = vcombine.low %v528_v24, %v532_v25 }
 0x360   : > { %2093 = vmatmul.mubr.bf16.vlgmr.msra.gmra.mxu0 %v3569_v35  ;;  %2150 = vmatprep.subr.bf16.mxu1 %v2733_v34  ;;  %v520_v33 = vld [vmem:[%s3416_s5 + $0x2c8] sm:$0xff]  ;;  %v2957_v9 = vcombine.high %v680_v28, %v684_v30  ;;  %v2956_v41 = vcombine.low %v680_v28, %v684_v30 }
 0x361   : > { %2184 = vmatpush1.bf16.msra.mxu0 %v2892_v52  ;;  %2215 = vmatprep.mubr.bf16.mxu0 %v3571_v36  ;;  %v436_v52 = vld [vmem:[%s3416_s5 + $0x28] sm:$0xff] }
 0x362   : > { %2185 = vmatprep.subr.bf16.mxu0 %v2885_v38  ;;  %v2709_v58 = vcombine.high %v432_v50, %v436_v52  ;;  %v2708_v63 = vcombine.low %v432_v50, %v436_v52  ;;  %v524_v34 = vld [vmem:[%s3416_s5 + $0x2e8] sm:$0xff] }
 0x363   : > { %2151 = vmatpush1.bf16.msra.mxu1 %v2732_v39  ;;  %v672_v38 = vld [vmem:[%s3416_s5 + $0x788] sm:$0xff]  ;;  %v2797_v40 = vcombine.high %v520_v33, %v524_v34  ;;  %v2796_v45 = vcombine.low %v520_v33, %v524_v34 }
 0x364   : > { %2152 = vmatprep.subr.bf16.mxu1 %v2725_v42  ;;  %v676_v39 = vld [vmem:[%s3416_s5 + $0x7a8] sm:$0xff] }
 0x365   : > { %2186 = vmatpush1.bf16.msra.mxu0 %v2884_v43  ;;  %v512_v42 = vld [vmem:[%s3416_s5 + $0x288] sm:$0xff]  ;;  %v2949_v44 = vcombine.high %v672_v38, %v676_v39  ;;  %v2948_v51 = vcombine.low %v672_v38, %v676_v39 }
 0x366   : > { %2187 = vmatprep.subr.bf16.mxu0 %v2877_v46  ;;  %v516_v43 = vld [vmem:[%s3416_s5 + $0x2a8] sm:$0xff] }
 0x367   : > { %2153 = vmatpush1.bf16.msra.mxu1 %v2724_v47  ;;  %v664_v46 = vld [vmem:[%s3416_s5 + $0x748] sm:$0xff]  ;;  %v2789_v48 = vcombine.high %v512_v42, %v516_v43  ;;  %v2788_v52 = vcombine.low %v512_v42, %v516_v43 }
 0x368   : > { %2154 = vmatprep.subr.bf16.mxu1 %v2717_v53  ;;  %v668_v47 = vld [vmem:[%s3416_s5 + $0x768] sm:$0xff] }
 0x369   : > { %2188 = vmatpush1.bf16.msra.mxu0 %v2876_v49  ;;  %v504_v53 = vld [vmem:[%s3416_s5 + $0x248] sm:$0xff]  ;;  %v2941_v50 = vcombine.high %v664_v46, %v668_v47  ;;  %v2940_v57 = vcombine.low %v664_v46, %v668_v47 }
 0x36a   : > { %2189 = vmatprep.subr.bf16.mxu0 %v2869_v54  ;;  %v508_v49 = vld [vmem:[%s3416_s5 + $0x268] sm:$0xff] }
 0x36b   : > { %2155 = vmatpush1.bf16.msra.mxu1 %v2716_v55  ;;  %v656_v54 = vld [vmem:[%s3416_s5 + $0x708] sm:$0xff]  ;;  %v2781_v56 = vcombine.high %v504_v53, %v508_v49  ;;  %v2780_v61 = vcombine.low %v504_v53, %v508_v49 }
 0x36c   : > { %2156 = vmatprep.subr.bf16.mxu1 %v2709_v58  ;;  %v660_v55 = vld [vmem:[%s3416_s5 + $0x728] sm:$0xff] }
 0x36d   : > { %2190 = vmatpush1.bf16.msra.mxu0 %v2868_v59  ;;  %v496_v58 = vld [vmem:[%s3416_s5 + $0x208] sm:$0xff]  ;;  %v2933_v60 = vcombine.high %v656_v54, %v660_v55  ;;  %v2932_v3 = vcombine.low %v656_v54, %v660_v55 }
 0x36e   : > { %2191 = vmatprep.subr.bf16.mxu0 %v2861_v62  ;;  %v500_v59 = vld [vmem:[%s3416_s5 + $0x228] sm:$0xff] }
 0x36f   : > { %2157 = vmatpush1.bf16.msra.mxu1 %v2708_v63  ;;  %v648_v62 = vld [vmem:[%s3416_s5 + $0x6c8] sm:$0xff]  ;;  %v2773_v2 = vcombine.high %v496_v58, %v500_v59  ;;  %v2772_v7 = vcombine.low %v496_v58, %v500_v59 }
 0x370   : > { %2158 = vmatprep.subr.bf16.mxu1 %v2829_v4  ;;  %v652_v63 = vld [vmem:[%s3416_s5 + $0x6e8] sm:$0xff] }
 0x371   : > { %2192 = vmatpush1.bf16.msra.mxu0 %v2860_v5  ;;  %v688_v4 = vld [vmem:[%s3416_s5 + $0x808] sm:$0xff]  ;;  %v2925_v6 = vcombine.high %v648_v62, %v652_v63  ;;  %v2924_v12 = vcombine.low %v648_v62, %v652_v63 }
 0x372   : > { %2193 = vmatprep.subr.bf16.mxu0 %v2853_v8  ;;  %v692_v5 = vld [vmem:[%s3416_s5 + $0x828] sm:$0xff] }
 0x373   : > { %2159 = vmatpush2.bf16.msra.mxu1 %v2828_v22  ;;  %v640_v8 = vld [vmem:[%s3416_s5 + $0x688] sm:$0xff]  ;;  %v2965_v11 = vcombine.high %v688_v4, %v692_v5  ;;  %v2964_v16 = vcombine.low %v688_v4, %v692_v5 }
 0x374   : > { %2160 = vmatprep.subr.bf16.mxu1 %v2821_v13  ;;  %v644_v22 = vld [vmem:[%s3416_s5 + $0x6a8] sm:$0xff]  ;;  %v617_v13 = vld [vmem:[%s3416_s5 + $0x5d0] sm:$0xff] }
 0x375   : > { %2194 = vmatpush1.bf16.msra.mxu0 %v2852_v14  ;;  %v621_v14 = vld [vmem:[%s3416_s5 + $0x5f0] sm:$0xff]  ;;  %v2917_v15 = vcombine.high %v640_v8, %v644_v22  ;;  %v2916_v20 = vcombine.low %v640_v8, %v644_v22  ;;  %v628_v24 = vld [vmem:[%s3416_s5 + $0x628] sm:$0xff] }
 0x376   : > { %2195 = vmatprep.subr.bf16.mxu0 %v2845_v17  ;;  %v632_v17 = vld [vmem:[%s3416_s5 + $0x648] sm:$0xff]  ;;  %v2895_v19 = vcombine.high %v617_v13, %v621_v14  ;;  %v2894_v30 = vcombine.low %v617_v13, %v621_v14 }
 0x377   : > { %2161 = vmatpush2.bf16.msra.mxu1 %v2820_v18  ;;  %v636_v18 = vld [vmem:[%s3416_s5 + $0x668] sm:$0xff] }
 0x378   : > { %2162 = vmatprep.subr.bf16.mxu1 %v2813_v21  ;;  %v2909_v21 = vcombine.high %v632_v17, %v636_v18  ;;  %v2908_v25 = vcombine.low %v632_v17, %v636_v18 }
 0x379   : > { %2196 = vmatpush1.bf16.msra.mxu0 %v2844_v23  ;;  %v624_v23 = vld [vmem:[%s3416_s5 + $0x608] sm:$0xff] }
 0x37a   : > { %2197 = vmatprep.subr.bf16.mxu0 %v2837_v26  ;;  %v609_v26 = vld [vmem:[%s3416_s5 + $0x590] sm:$0xff]  ;;  %v2901_v28 = vcombine.high %v624_v23, %v628_v24  ;;  %v2900_v34 = vcombine.low %v624_v23, %v628_v24 }
 0x37b   : > { %2163 = vmatpush2.bf16.msra.mxu1 %v2812_v27  ;;  %v613_v27 = vld [vmem:[%s3416_s5 + $0x5b0] sm:$0xff] }
 0x37c   : > { %2164 = vmatprep.subr.bf16.mxu1 %v2805_v31  ;;  %v489_v31 = vld [vmem:[%s3416_s5 + $0x1d0] sm:$0xff]  ;;  %v2887_v33 = vcombine.high %v609_v26, %v613_v27  ;;  %v2886_v39 = vcombine.low %v609_v26, %v613_v27 }
 0x37d   : > { %2198 = vmatpush1.bf16.msra.mxu0 %v2836_v32  ;;  %v493_v32 = vld [vmem:[%s3416_s5 + $0x1f0] sm:$0xff] }
 0x37e   : > { %2199 = vmatprep.subr.bf16.mxu0 %v2957_v9  ;;  %v601_v9 = vld [vmem:[%s3416_s5 + $0x550] sm:$0xff]  ;;  %v2767_v38 = vcombine.high %v489_v31, %v493_v32  ;;  %v2766_v43 = vcombine.low %v489_v31, %v493_v32 }
 0x37f   : > { %2165 = vmatpush2.bf16.msra.mxu1 %v2804_v37  ;;  %v605_v37 = vld [vmem:[%s3416_s5 + $0x570] sm:$0xff] }
 0x380   : > { %2166 = vmatprep.subr.bf16.mxu1 %v2797_v40  ;;  %v481_v40 = vld [vmem:[%s3416_s5 + $0x190] sm:$0xff]  ;;  %v2879_v42 = vcombine.high %v601_v9, %v605_v37  ;;  %v2878_v47 = vcombine.low %v601_v9, %v605_v37 }
 0x381   : > { %2200 = vmatpush2.bf16.msra.mxu0 %v2956_v41  ;;  %v485_v41 = vld [vmem:[%s3416_s5 + $0x1b0] sm:$0xff] }
 0x382   : > { %2201 = vmatprep.subr.bf16.mxu0 %v2949_v44  ;;  %v593_v44 = vld [vmem:[%s3416_s5 + $0x510] sm:$0xff]  ;;  %v2759_v46 = vcombine.high %v481_v40, %v485_v41  ;;  %v2758_v49 = vcombine.low %v481_v40, %v485_v41 }
 0x383   : > { %2167 = vmatpush2.bf16.msra.mxu1 %v2796_v45  ;;  %v597_v45 = vld [vmem:[%s3416_s5 + $0x530] sm:$0xff] }
 0x384   : > { %2168 = vmatprep.subr.bf16.mxu1 %v2789_v48  ;;  %v473_v48 = vld [vmem:[%s3416_s5 + $0x150] sm:$0xff]  ;;  %v2871_v53 = vcombine.high %v593_v44, %v597_v45  ;;  %v2870_v55 = vcombine.low %v593_v44, %v597_v45 }
 0x385   : > { %2202 = vmatpush2.bf16.msra.mxu0 %v2948_v51  ;;  %v477_v51 = vld [vmem:[%s3416_s5 + $0x170] sm:$0xff] }
 0x386   : > { %2203 = vmatprep.subr.bf16.mxu0 %v2941_v50  ;;  %v585_v50 = vld [vmem:[%s3416_s5 + $0x4d0] sm:$0xff]  ;;  %v2751_v54 = vcombine.high %v473_v48, %v477_v51  ;;  %v2750_v59 = vcombine.low %v473_v48, %v477_v51 }
 0x387   : > { %2169 = vmatpush2.bf16.msra.mxu1 %v2788_v52  ;;  %v589_v52 = vld [vmem:[%s3416_s5 + $0x4f0] sm:$0xff] }
 0x388   : > { %2170 = vmatprep.subr.bf16.mxu1 %v2781_v56  ;;  %v465_v56 = vld [vmem:[%s3416_s5 + $0x110] sm:$0xff]  ;;  %v2863_v58 = vcombine.high %v585_v50, %v589_v52  ;;  %v2862_v63 = vcombine.low %v585_v50, %v589_v52 }
 0x389   : > { %2204 = vmatpush2.bf16.msra.mxu0 %v2940_v57  ;;  %v469_v57 = vld [vmem:[%s3416_s5 + $0x130] sm:$0xff] }
 0x38a   : > { %2205 = vmatprep.subr.bf16.mxu0 %v2933_v60  ;;  %v577_v60 = vld [vmem:[%s3416_s5 + $0x490] sm:$0xff]  ;;  %v2743_v62 = vcombine.high %v465_v56, %v469_v57  ;;  %v2742_v5 = vcombine.low %v465_v56, %v469_v57 }
 0x38b   : > { %2171 = vmatpush2.bf16.msra.mxu1 %v2780_v61  ;;  %v581_v61 = vld [vmem:[%s3416_s5 + $0x4b0] sm:$0xff] }
 0x38c   : > { %2172 = vmatprep.subr.bf16.mxu1 %v2773_v2  ;;  %v457_v2 = vld [vmem:[%s3416_s5 + $0xd0] sm:$0xff]  ;;  %v2855_v4 = vcombine.high %v577_v60, %v581_v61  ;;  %v2854_v22 = vcombine.low %v577_v60, %v581_v61 }
 0x38d   : > { %2206 = vmatpush2.bf16.msra.mxu0 %v2932_v3  ;;  %v461_v3 = vld [vmem:[%s3416_s5 + $0xf0] sm:$0xff] }
 0x38e   : > { %2207 = vmatprep.subr.bf16.mxu0 %v2925_v6  ;;  %v569_v6 = vld [vmem:[%s3416_s5 + $0x450] sm:$0xff]  ;;  %v2735_v8 = vcombine.high %v457_v2, %v461_v3  ;;  %v2734_v14 = vcombine.low %v457_v2, %v461_v3 }
 0x38f   : > { %2173 = vmatpush2.bf16.msra.mxu1 %v2772_v7  ;;  %v573_v7 = vld [vmem:[%s3416_s5 + $0x470] sm:$0xff] }
 0x390   : > { %2238 = vmatprep.subr.bf16.mxu1 %v2965_v11  ;;  %v449_v11 = vld [vmem:[%s3416_s5 + $0x90] sm:$0xff]  ;;  %v2847_v13 = vcombine.high %v569_v6, %v573_v7  ;;  %v2846_v18 = vcombine.low %v569_v6, %v573_v7 }
 0x391   : > { %2208 = vmatpush2.bf16.msra.mxu0 %v2924_v12  ;;  %v453_v12 = vld [vmem:[%s3416_s5 + $0xb0] sm:$0xff] }
 0x392   : > { %2175 = vmatmul.mubr.bf16.vlgmr.msra.gmra.mxu1 %v3539_v0  ;;  %2209 = vmatprep.subr.bf16.mxu0 %v2917_v15  ;;  %v561_v15 = vld [vmem:[%s3416_s5 + $0x410] sm:$0xff]  ;;  %v2727_v17 = vcombine.high %v449_v11, %v453_v12  ;;  %v2726_v23 = vcombine.low %v449_v11, %v453_v12 }
 0x393   : > { %2239 = vmatpush1.bf16.msra.mxu1 %v2964_v16  ;;  %2256 = vmatprep.mubr.bf16.mxu1 %v3268_v29  ;;  %v565_v16 = vld [vmem:[%s3416_s5 + $0x430] sm:$0xff] }
 0x394   : > { %2306 = vmatprep.subr.bf16.mxu1 %v2895_v19  ;;  %v441_v19 = vld [vmem:[%s3416_s5 + $0x50] sm:$0xff]  ;;  %v2838_v27 = vcombine.low %v561_v15, %v565_v16 }
 0x395   : > { %2210 = vmatpush2.bf16.msra.mxu0 %v2916_v20  ;;  %v445_v20 = vld [vmem:[%s3416_s5 + $0x70] sm:$0xff] }
 0x396   : > { %2211 = vmatprep.subr.bf16.mxu0 %v2909_v21  ;;  %v2839_v21 = vcombine.high %v561_v15, %v565_v16  ;;  %v681_v24 = vld [vmem:[%s3416_s5 + $0x7d0] sm:$0xff]  ;;  %v2719_v26 = vcombine.high %v441_v19, %v445_v20  ;;  %v2718_v32 = vcombine.low %v441_v19, %v445_v20 }
 0x399   : > { %2212 = vmatpush2.bf16.msra.mxu0 %v2908_v25  ;;  %v685_v25 = vld [vmem:[%s3416_s5 + $0x7f0] sm:$0xff] }
 0x39a   : > { %2971 = vmatmul.mubr.msk.bf16.vlgmr.msra.gmra.mxu1 %vm2015_vm4, %v3552_v10  ;;  %2213 = vmatprep.subr.bf16.mxu0 %v2901_v28  ;;  %v433_v28 = vld [vmem:[%s3416_s5 + $0x10] sm:$0xff]  ;;  %v2959_v31 = vcombine.high %v681_v24, %v685_v25  ;;  %v2958_v37 = vcombine.low %v681_v24, %v685_v25 }
 0x39b   : > { %2307 = vmatpush1.bf16.msra.mxu1 %v2894_v30  ;;  %2338 = vmatprep.mubr.bf16.mxu1 %v3571_v36  ;;  %v437_v30 = vld [vmem:[%s3416_s5 + $0x30] sm:$0xff] }
 0x39c   : > { %2308 = vmatprep.subr.bf16.mxu1 %v2887_v33  ;;  %v673_v33 = vld [vmem:[%s3416_s5 + $0x790] sm:$0xff]  ;;  %v2711_v9 = vcombine.high %v433_v28, %v437_v30  ;;  %v2710_v41 = vcombine.low %v433_v28, %v437_v30 }
 0x39d   : > { %2214 = vmatpush2.bf16.msra.mxu0 %v2900_v34  ;;  %v677_v34 = vld [vmem:[%s3416_s5 + $0x7b0] sm:$0xff] }
 0x39e   : > { %2265 = vmatprep.subr.bf16.mxu0 %v2767_v38  ;;  %v553_v38 = vld [vmem:[%s3416_s5 + $0x3d0] sm:$0xff]  ;;  %v2951_v40 = vcombine.high %v673_v33, %v677_v34  ;;  %v2950_v45 = vcombine.low %v673_v33, %v677_v34 }
 0x39f   : > { %2309 = vmatpush1.bf16.msra.mxu1 %v2886_v39  ;;  %v557_v39 = vld [vmem:[%s3416_s5 + $0x3f0] sm:$0xff] }
 0x3a0   : > { %2216 = vmatmul.mubr.bf16.vlgmr.msra.gmra.mxu0 %v3569_v35  ;;  %2310 = vmatprep.subr.bf16.mxu1 %v2879_v42  ;;  %v665_v42 = vld [vmem:[%s3416_s5 + $0x750] sm:$0xff]  ;;  %v2831_v44 = vcombine.high %v553_v38, %v557_v39  ;;  %v2830_v51 = vcombine.low %v553_v38, %v557_v39 }
 0x3a1   : > { %2266 = vmatpush1.bf16.msra.mxu0 %v2766_v43  ;;  %2297 = vmatprep.mubr.bf16.mxu0 %v3541_v1  ;;  %v669_v43 = vld [vmem:[%s3416_s5 + $0x770] sm:$0xff] }
 0x3a2   : > { %2267 = vmatprep.subr.bf16.mxu0 %v2759_v46  ;;  %v545_v46 = vld [vmem:[%s3416_s5 + $0x390] sm:$0xff]  ;;  %v2943_v48 = vcombine.high %v665_v42, %v669_v43  ;;  %v2942_v52 = vcombine.low %v665_v42, %v669_v43 }
 0x3a3   : > { %2311 = vmatpush1.bf16.msra.mxu1 %v2878_v47  ;;  %v549_v47 = vld [vmem:[%s3416_s5 + $0x3b0] sm:$0xff] }
 0x3a4   : > { %2312 = vmatprep.subr.bf16.mxu1 %v2871_v53  ;;  %v657_v53 = vld [vmem:[%s3416_s5 + $0x710] sm:$0xff]  ;;  %v2823_v50 = vcombine.high %v545_v46, %v549_v47  ;;  %v2822_v57 = vcombine.low %v545_v46, %v549_v47 }
 0x3a5   : > { %2268 = vmatpush1.bf16.msra.mxu0 %v2758_v49  ;;  %v661_v49 = vld [vmem:[%s3416_s5 + $0x730] sm:$0xff] }
 0x3a6   : > { %2269 = vmatprep.subr.bf16.mxu0 %v2751_v54  ;;  %v537_v54 = vld [vmem:[%s3416_s5 + $0x350] sm:$0xff]  ;;  %v2935_v56 = vcombine.high %v657_v53, %v661_v49  ;;  %v2934_v61 = vcombine.low %v657_v53, %v661_v49 }
 0x3a7   : > { %2313 = vmatpush1.bf16.msra.mxu1 %v2870_v55  ;;  %v541_v55 = vld [vmem:[%s3416_s5 + $0x370] sm:$0xff] }
 0x3a8   : > { %2314 = vmatprep.subr.bf16.mxu1 %v2863_v58  ;;  %v649_v58 = vld [vmem:[%s3416_s5 + $0x6d0] sm:$0xff]  ;;  %v2815_v60 = vcombine.high %v537_v54, %v541_v55  ;;  %v2814_v3 = vcombine.low %v537_v54, %v541_v55 }
 0x3a9   : > { %2270 = vmatpush1.bf16.msra.mxu0 %v2750_v59  ;;  %v653_v59 = vld [vmem:[%s3416_s5 + $0x6f0] sm:$0xff] }
 0x3aa   : > { %2271 = vmatprep.subr.bf16.mxu0 %v2743_v62  ;;  %v529_v62 = vld [vmem:[%s3416_s5 + $0x310] sm:$0xff]  ;;  %v2927_v2 = vcombine.high %v649_v58, %v653_v59  ;;  %v2926_v7 = vcombine.low %v649_v58, %v653_v59 }
 0x3ab   : > { %2315 = vmatpush1.bf16.msra.mxu1 %v2862_v63  ;;  %v533_v63 = vld [vmem:[%s3416_s5 + $0x330] sm:$0xff] }
 0x3ac   : > { %2316 = vmatprep.subr.bf16.mxu1 %v2855_v4  ;;  %v641_v4 = vld [vmem:[%s3416_s5 + $0x690] sm:$0xff]  ;;  %v2807_v6 = vcombine.high %v529_v62, %v533_v63  ;;  %v2806_v12 = vcombine.low %v529_v62, %v533_v63  ;;  %v610_v63 = vld [vmem:[%s3416_s5 + $0x598] sm:$0xff] }
 0x3ad   : > { %2272 = vmatpush1.bf16.msra.mxu0 %v2742_v5  ;;  %v645_v5 = vld [vmem:[%s3416_s5 + $0x6b0] sm:$0xff] }
 0x3ae   : > { %2273 = vmatprep.subr.bf16.mxu0 %v2735_v8  ;;  %v521_v8 = vld [vmem:[%s3416_s5 + $0x2d0] sm:$0xff]  ;;  %v2919_v11 = vcombine.high %v641_v4, %v645_v5  ;;  %v2918_v16 = vcombine.low %v641_v4, %v645_v5  ;;  %v450_v5 = vld [vmem:[%s3416_s5 + $0x98] sm:$0xff] }
 0x3af   : > { %2317 = vmatpush1.bf16.msra.mxu1 %v2854_v22  ;;  %v525_v22 = vld [vmem:[%s3416_s5 + $0x2f0] sm:$0xff] }
 0x3b0   : > { %2318 = vmatprep.subr.bf16.mxu1 %v2847_v13  ;;  %v633_v13 = vld [vmem:[%s3416_s5 + $0x650] sm:$0xff]  ;;  %v2799_v15 = vcombine.high %v521_v8, %v525_v22  ;;  %v2798_v20 = vcombine.low %v521_v8, %v525_v22  ;;  %v602_v22 = vld [vmem:[%s3416_s5 + $0x558] sm:$0xff] }
 0x3b1   : > { %2274 = vmatpush1.bf16.msra.mxu0 %v2734_v14  ;;  %v637_v14 = vld [vmem:[%s3416_s5 + $0x670] sm:$0xff] }
 0x3b2   : > { %2275 = vmatprep.subr.bf16.mxu0 %v2727_v17  ;;  %v513_v17 = vld [vmem:[%s3416_s5 + $0x290] sm:$0xff]  ;;  %v2911_v19 = vcombine.high %v633_v13, %v637_v14  ;;  %v2910_v25 = vcombine.low %v633_v13, %v637_v14  ;;  %v442_v14 = vld [vmem:[%s3416_s5 + $0x58] sm:$0xff] }
 0x3b3   : > { %2319 = vmatpush1.bf16.msra.mxu1 %v2846_v18  ;;  %v517_v18 = vld [vmem:[%s3416_s5 + $0x2b0] sm:$0xff] }
 0x3b4   : > { %2320 = vmatprep.subr.bf16.mxu1 %v2839_v21  ;;  %v625_v21 = vld [vmem:[%s3416_s5 + $0x610] sm:$0xff]  ;;  %v2791_v24 = vcombine.high %v513_v17, %v517_v18  ;;  %v2790_v30 = vcombine.low %v513_v17, %v517_v18  ;;  %v594_v18 = vld [vmem:[%s3416_s5 + $0x518] sm:$0xff] }
 0x3b5   : > { %2276 = vmatpush1.bf16.msra.mxu0 %v2726_v23  ;;  %v629_v23 = vld [vmem:[%s3416_s5 + $0x630] sm:$0xff] }
 0x3b6   : > { %2277 = vmatprep.subr.bf16.mxu0 %v2719_v26  ;;  %v505_v26 = vld [vmem:[%s3416_s5 + $0x250] sm:$0xff]  ;;  %v2903_v28 = vcombine.high %v625_v21, %v629_v23  ;;  %v2902_v34 = vcombine.low %v625_v21, %v629_v23  ;;  %v434_v23 = vld [vmem:[%s3416_s5 + $0x18] sm:$0xff] }
 0x3b7   : > { %2321 = vmatpush1.bf16.msra.mxu1 %v2838_v27  ;;  %v509_v27 = vld [vmem:[%s3416_s5 + $0x270] sm:$0xff] }
 0x3b8   : > { %2322 = vmatprep.subr.bf16.mxu1 %v2959_v31  ;;  %v490_v31 = vld [vmem:[%s3416_s5 + $0x1d8] sm:$0xff]  ;;  %v2783_v33 = vcombine.high %v505_v26, %v509_v27  ;;  %v2782_v39 = vcombine.low %v505_v26, %v509_v27 }
 0x3b9   : > { %2278 = vmatpush1.bf16.msra.mxu0 %v2718_v32  ;;  %v494_v32 = vld [vmem:[%s3416_s5 + $0x1f8] sm:$0xff] }
 0x3ba   : > { %2279 = vmatprep.subr.bf16.mxu0 %v2711_v9  ;;  %v497_v9 = vld [vmem:[%s3416_s5 + $0x210] sm:$0xff]  ;;  %v2769_v38 = vcombine.high %v490_v31, %v494_v32  ;;  %v2768_v43 = vcombine.low %v490_v31, %v494_v32  ;;  %v586_v26 = vld [vmem:[%s3416_s5 + $0x4d8] sm:$0xff] }
 0x3bb   : > { %2323 = vmatpush2.bf16.msra.mxu1 %v2958_v37  ;;  %v501_v37 = vld [vmem:[%s3416_s5 + $0x230] sm:$0xff]  ;;  %v590_v27 = vld [vmem:[%s3416_s5 + $0x4f8] sm:$0xff] }
 0x3bc   : > { %2324 = vmatprep.subr.bf16.mxu1 %v2951_v40  ;;  %v482_v40 = vld [vmem:[%s3416_s5 + $0x198] sm:$0xff]  ;;  %v2775_v42 = vcombine.high %v497_v9, %v501_v37  ;;  %v2774_v47 = vcombine.low %v497_v9, %v501_v37 }
 0x3bd   : > { %2280 = vmatpush1.bf16.msra.mxu0 %v2710_v41  ;;  %v486_v41 = vld [vmem:[%s3416_s5 + $0x1b8] sm:$0xff] }
 0x3be   : > { %2281 = vmatprep.subr.bf16.mxu0 %v2831_v44  ;;  %v689_v44 = vld [vmem:[%s3416_s5 + $0x810] sm:$0xff]  ;;  %v2761_v46 = vcombine.high %v482_v40, %v486_v41  ;;  %v2760_v49 = vcombine.low %v482_v40, %v486_v41  ;;  %v554_v31 = vld [vmem:[%s3416_s5 + $0x3d8] sm:$0xff] }
 0x3bf   : > { %2325 = vmatpush2.bf16.msra.mxu1 %v2950_v45  ;;  %v693_v45 = vld [vmem:[%s3416_s5 + $0x830] sm:$0xff]  ;;  %v558_v32 = vld [vmem:[%s3416_s5 + $0x3f8] sm:$0xff] }
 0x3c0   : > { %2326 = vmatprep.subr.bf16.mxu1 %v2943_v48  ;;  %v474_v48 = vld [vmem:[%s3416_s5 + $0x158] sm:$0xff]  ;;  %v2967_v53 = vcombine.high %v689_v44, %v693_v45  ;;  %v2966_v55 = vcombine.low %v689_v44, %v693_v45 }
 0x3c1   : > { %2282 = vmatpush2.bf16.msra.mxu0 %v2830_v51  ;;  %v478_v51 = vld [vmem:[%s3416_s5 + $0x178] sm:$0xff] }
 0x3c2   : > { %2283 = vmatprep.subr.bf16.mxu0 %v2823_v50  ;;  %v618_v50 = vld [vmem:[%s3416_s5 + $0x5d8] sm:$0xff]  ;;  %v2753_v54 = vcombine.high %v474_v48, %v478_v51  ;;  %v2752_v59 = vcombine.low %v474_v48, %v478_v51 }
 0x3c3   : > { %2327 = vmatpush2.bf16.msra.mxu1 %v2942_v52  ;;  %v622_v52 = vld [vmem:[%s3416_s5 + $0x5f8] sm:$0xff] }
 0x3c4   : > { %2328 = vmatprep.subr.bf16.mxu1 %v2935_v56  ;;  %v466_v56 = vld [vmem:[%s3416_s5 + $0x118] sm:$0xff]  ;;  %v2897_v58 = vcombine.high %v618_v50, %v622_v52  ;;  %v2896_v4 = vcombine.low %v618_v50, %v622_v52 }
 0x3c5   : > { %2284 = vmatpush2.bf16.msra.mxu0 %v2822_v57  ;;  %v470_v57 = vld [vmem:[%s3416_s5 + $0x138] sm:$0xff] }
 0x3c6   : > { %2285 = vmatprep.subr.bf16.mxu0 %v2815_v60  ;;  %v458_v60 = vld [vmem:[%s3416_s5 + $0xd8] sm:$0xff]  ;;  %v2744_v62 = vcombine.low %v466_v56, %v470_v57 }
 0x3c7   : > { %2329 = vmatpush2.bf16.msra.mxu1 %v2934_v61  ;;  %v462_v61 = vld [vmem:[%s3416_s5 + $0xf8] sm:$0xff] }
 0x3c8   : > { %2330 = vmatprep.subr.bf16.mxu1 %v2927_v2  ;;  %v614_v2 = vld [vmem:[%s3416_s5 + $0x5b8] sm:$0xff]  ;;  %v2736_v8 = vcombine.low %v458_v60, %v462_v61 }
 0x3c9   : > { %2286 = vmatpush2.bf16.msra.mxu0 %v2814_v3  ;;  %v2737_v3 = vcombine.high %v458_v60, %v462_v61  ;;  %v2888_v13 = vcombine.low %v610_v63, %v614_v2  ;;  %v578_v9 = vld [vmem:[%s3416_s5 + $0x498] sm:$0xff] }
 0x3ca   : > { %2287 = vmatprep.subr.bf16.mxu0 %v2807_v6  ;;  %v454_v6 = vld [vmem:[%s3416_s5 + $0xb8] sm:$0xff] }
 0x3cb   : > { %2331 = vmatpush2.bf16.msra.mxu1 %v2926_v7  ;;  %v2889_v7 = vcombine.high %v610_v63, %v614_v2  ;;  %v2728_v17 = vcombine.low %v450_v5, %v454_v6  ;;  %v582_v37 = vld [vmem:[%s3416_s5 + $0x4b8] sm:$0xff] }
 0x3cc   : > { %2332 = vmatprep.subr.bf16.mxu1 %v2919_v11  ;;  %v606_v11 = vld [vmem:[%s3416_s5 + $0x578] sm:$0xff] }
 0x3cd   : > { %2288 = vmatpush2.bf16.msra.mxu0 %v2806_v12  ;;  %v2729_v12 = vcombine.high %v450_v5, %v454_v6  ;;  %v2880_v21 = vcombine.low %v602_v22, %v606_v11  ;;  %v546_v40 = vld [vmem:[%s3416_s5 + $0x398] sm:$0xff] }
 0x3ce   : > { %2289 = vmatprep.subr.bf16.mxu0 %v2799_v15  ;;  %v446_v15 = vld [vmem:[%s3416_s5 + $0x78] sm:$0xff] }
 0x3cf   : > { %2333 = vmatpush2.bf16.msra.mxu1 %v2918_v16  ;;  %v2881_v16 = vcombine.high %v602_v22, %v606_v11  ;;  %v550_v41 = vld [vmem:[%s3416_s5 + $0x3b8] sm:$0xff] }
 0x3d0   : > { %2334 = vmatprep.subr.bf16.mxu1 %v2911_v19  ;;  %v598_v19 = vld [vmem:[%s3416_s5 + $0x538] sm:$0xff] }
 0x3d1   : > { %2290 = vmatpush2.bf16.msra.mxu0 %v2798_v20  ;;  %v2721_v20 = vcombine.high %v442_v14, %v446_v15  ;;  %v570_v44 = vld [vmem:[%s3416_s5 + $0x458] sm:$0xff] }
 0x3d2   : > { %2291 = vmatprep.subr.bf16.mxu0 %v2791_v24  ;;  %v438_v24 = vld [vmem:[%s3416_s5 + $0x38] sm:$0xff] }
 0x3d3   : > { %2335 = vmatpush2.bf16.msra.mxu1 %v2910_v25  ;;  %v2720_v25 = vcombine.low %v442_v14, %v446_v15  ;;  %v574_v45 = vld [vmem:[%s3416_s5 + $0x478] sm:$0xff] }
 0x3d4   : > { %2336 = vmatprep.subr.bf16.mxu1 %v2903_v28  ;;  %v2713_v28 = vcombine.high %v434_v23, %v438_v24  ;;  %v538_v48 = vld [vmem:[%s3416_s5 + $0x358] sm:$0xff] }
 0x3d5   : > { %2292 = vmatpush2.bf16.msra.mxu0 %v2790_v30  ;;  %v2872_v30 = vcombine.low %v594_v18, %v598_v19  ;;  %v542_v51 = vld [vmem:[%s3416_s5 + $0x378] sm:$0xff] }
 0x3d6   : > { %2293 = vmatprep.subr.bf16.mxu0 %v2783_v33  ;;  %v2865_v33 = vcombine.high %v586_v26, %v590_v27  ;;  %v562_v50 = vld [vmem:[%s3416_s5 + $0x418] sm:$0xff] }
 0x3d7   : > { %2337 = vmatpush2.bf16.msra.mxu1 %v2902_v34  ;;  %v2712_v34 = vcombine.low %v434_v23, %v438_v24  ;;  %v566_v52 = vld [vmem:[%s3416_s5 + $0x438] sm:$0xff] }
 0x3d8   : > { %2388 = vmatprep.subr.bf16.mxu1 %v2769_v38  ;;  %v2833_v38 = vcombine.high %v554_v31, %v558_v32  ;;  %v686_v60 = vld [vmem:[%s3416_s5 + $0x7f8] sm:$0xff] }
 0x3d9   : > { %2294 = vmatpush2.bf16.msra.mxu0 %v2782_v39  ;;  %v2864_v39 = vcombine.low %v586_v26, %v590_v27  ;;  %v522_v63 = vld [vmem:[%s3416_s5 + $0x2d8] sm:$0xff] }
 0x3da   : > { %2339 = vmatmul.mubr.bf16.vlgmr.msra.gmra.mxu1 %v3569_v35  ;;  %2295 = vmatprep.subr.bf16.mxu0 %v2775_v42  ;;  %v2857_v42 = vcombine.high %v578_v9, %v582_v37  ;;  %v526_v2 = vld [vmem:[%s3416_s5 + $0x2f8] sm:$0xff] }
 0x3db   : > { %2389 = vmatpush1.bf16.msra.mxu1 %v2768_v43  ;;  %2420 = vmatprep.mubr.bf16.mxu1 %v3541_v1  ;;  %v2745_v1 = vcombine.high %v466_v56, %v470_v57  ;;  %v2832_v43 = vcombine.low %v554_v31, %v558_v32  ;;  %v530_v56 = vld [vmem:[%s3416_s5 + $0x318] sm:$0xff] }
 0x3dc   : > { %2390 = vmatprep.subr.bf16.mxu1 %v2761_v46  ;;  %v2825_v46 = vcombine.high %v546_v40, %v550_v41  ;;  %v534_v57 = vld [vmem:[%s3416_s5 + $0x338] sm:$0xff] }
 0x3dd   : > { %2296 = vmatpush2.bf16.msra.mxu0 %v2774_v47  ;;  %v2856_v47 = vcombine.low %v578_v9, %v582_v37  ;;  %v2809_v61 = vcombine.high %v530_v56, %v534_v57  ;;  %v674_v5 = vld [vmem:[%s3416_s5 + $0x798] sm:$0xff] }
 0x3de   : > { %2361 = vmatprep.subr.bf16.mxu0 %v2967_v53  ;;  %v2849_v53 = vcombine.high %v570_v44, %v574_v45  ;;  %v678_v6 = vld [vmem:[%s3416_s5 + $0x7b8] sm:$0xff] }
 0x3df   : > { %2391 = vmatpush1.bf16.msra.mxu1 %v2760_v49  ;;  %v2824_v49 = vcombine.low %v546_v40, %v550_v41  ;;  %v514_v22 = vld [vmem:[%s3416_s5 + $0x298] sm:$0xff] }
 0x3e0   : > { %2298 = vmatmul.mubr.bf16.vlgmr.msra.gmra.mxu0 %v3539_v0  ;;  %2392 = vmatprep.subr.bf16.mxu1 %v2753_v54  ;;  %v2817_v54 = vcombine.high %v538_v48, %v542_v51  ;;  %v518_v11 = vld [vmem:[%s3416_s5 + $0x2b8] sm:$0xff] }
 0x3e1   : > { %2362 = vmatpush1.bf16.msra.mxu0 %v2966_v55  ;;  %2379 = vmatprep.mubr.bf16.mxu0 %v3268_v29  ;;  %v2848_v55 = vcombine.low %v570_v44, %v574_v45  ;;  %v666_v14 = vld [vmem:[%s3416_s5 + $0x758] sm:$0xff]  ;;  %v2792_v23 = vcombine.low %v514_v22, %v518_v11 }
 0x3e2   : > { %2429 = vmatprep.subr.bf16.mxu0 %v2897_v58  ;;  %v2841_v58 = vcombine.high %v562_v50, %v566_v52  ;;  %v670_v15 = vld [vmem:[%s3416_s5 + $0x778] sm:$0xff] }
 0x3e3   : > { %2393 = vmatpush1.bf16.msra.mxu1 %v2752_v59  ;;  %v2816_v59 = vcombine.low %v538_v48, %v542_v51  ;;  %v658_v24 = vld [vmem:[%s3416_s5 + $0x718] sm:$0xff]  ;;  %v2944_v27 = vcombine.low %v666_v14, %v670_v15 }
 0x3e4   : > { %2394 = vmatprep.subr.bf16.mxu1 %v2745_v1  ;;  %v682_v1 = vld [vmem:[%s3416_s5 + $0x7d8] sm:$0xff] }
 0x3e5   : > { %v654_v9 = vld [vmem:[%s3416_s5 + $0x6f8] sm:$0xff] }
 0x3e6   : > { %v690_v40 = vld [vmem:[%s3416_s5 + $0x818] sm:$0xff] }
 0x3e7   : > { %2395 = vmatpush1.bf16.msra.mxu1 %v2744_v62  ;;  %v2840_v62 = vcombine.low %v562_v50, %v566_v52  ;;  %v694_v41 = vld [vmem:[%s3416_s5 + $0x838] sm:$0xff] }
 0x3e8   : > { %2972 = vmatmul.mubr.msk.bf16.vlgmr.msra.gmra.mxu0 %vm2015_vm4, %v3552_v10  ;;  %2396 = vmatprep.subr.bf16.mxu1 %v2737_v3  ;;  %v2961_v3 = vcombine.high %v682_v1, %v686_v60  ;;  %v642_v45 = vld [vmem:[%s3416_s5 + $0x698] sm:$0xff]  ;;  %v2969_v48 = vcombine.high %v690_v40, %v694_v41  ;;  %v2968_v50 = vcombine.low %v690_v40, %v694_v41 }
 0x3e9   : > { %2430 = vmatpush1.bf16.msra.mxu0 %v2896_v4  ;;  %2461 = vmatprep.mubr.bf16.mxu0 %v3571_v36  ;;  %v2873_v36 = vcombine.high %v594_v18, %v598_v19  ;;  %v2808_v4 = vcombine.low %v530_v56, %v534_v57  ;;  %v506_v18 = vld [vmem:[%s3416_s5 + $0x258] sm:$0xff] }
 0x3ea   : > { %2431 = vmatprep.subr.bf16.mxu0 %v2889_v7  ;;  %v2801_v7 = vcombine.high %v522_v63, %v526_v2  ;;  %v510_v19 = vld [vmem:[%s3416_s5 + $0x278] sm:$0xff] }
 0x3eb   : > { %2397 = vmatpush1.bf16.msra.mxu1 %v2736_v8  ;;  %v2960_v8 = vcombine.low %v682_v1, %v686_v60  ;;  %v2785_v26 = vcombine.high %v506_v18, %v510_v19  ;;  %v634_v52 = vld [vmem:[%s3416_s5 + $0x658] sm:$0xff] }
 0x3ec   : > { %2398 = vmatprep.subr.bf16.mxu1 %v2729_v12  ;;  %v2953_v12 = vcombine.high %v674_v5, %v678_v6 }
 0x3ed   : > { %2432 = vmatpush1.bf16.msra.mxu0 %v2888_v13  ;;  %v2800_v13 = vcombine.low %v522_v63, %v526_v2 }
 0x3ee   : > { %2433 = vmatprep.subr.bf16.mxu0 %v2881_v16  ;;  %v2793_v16 = vcombine.high %v514_v22, %v518_v11 }
 0x3ef   : > { %2399 = vmatpush1.bf16.msra.mxu1 %v2728_v17  ;;  %v2952_v17 = vcombine.low %v674_v5, %v678_v6 }
 0x3f0   : > { %2400 = vmatprep.subr.bf16.mxu1 %v2721_v20 }
 0x3f1   : > { %2434 = vmatpush1.bf16.msra.mxu0 %v2880_v21  ;;  %v2945_v21 = vcombine.high %v666_v14, %v670_v15  ;;  %v3272_v14 = vmov 1983009808   ;;  %v2524_v15 = vlaneseq }
 0x3f2   : > { %2435 = vmatprep.subr.bf16.mxu0 %v2873_v36  ;;  %v662_v36 = vld [vmem:[%s3416_s5 + $0x738] sm:$0xff] }
 0x3f3   : > { %2401 = vmatpush1.bf16.msra.mxu1 %v2720_v25  ;;  %v2937_v32 = vcombine.high %v658_v24, %v662_v36 }
 0x3f4   : > { %2402 = vmatprep.subr.bf16.mxu1 %v2713_v28  ;;  %v498_v28 = vld [vmem:[%s3416_s5 + $0x218] sm:$0xff] }
 0x3f5   : > { %2436 = vmatpush1.bf16.msra.mxu0 %v2872_v30  ;;  %v502_v30 = vld [vmem:[%s3416_s5 + $0x238] sm:$0xff] }
 0x3f6   : > { %2437 = vmatprep.subr.bf16.mxu0 %v2865_v33  ;;  %v2784_v33 = vcombine.low %v506_v18, %v510_v19  ;;  %v2776_v44 = vcombine.low %v498_v28, %v502_v30 }
 0x3f7   : > { %2403 = vmatpush1.bf16.msra.mxu1 %v2712_v34  ;;  %v650_v34 = vld [vmem:[%s3416_s5 + $0x6d8] sm:$0xff] }
 0x3f8   : > { %2404 = vmatprep.subr.bf16.mxu1 %v2833_v38  ;;  %v2777_v38 = vcombine.high %v498_v28, %v502_v30  ;;  %v2928_v51 = vcombine.low %v650_v34, %v654_v9 }
 0x3f9   : > { %2438 = vmatpush1.bf16.msra.mxu0 %v2864_v39  ;;  %v2936_v39 = vcombine.low %v658_v24, %v662_v36 }
 0x3fa   : > { %2439 = vmatprep.subr.bf16.mxu0 %v2857_v42 }
 0x3fb   : > { %2405 = vmatpush2.bf16.msra.mxu1 %v2832_v43  ;;  %v2929_v43 = vcombine.high %v650_v34, %v654_v9 }
 0x3fc   : > { %2406 = vmatprep.subr.bf16.mxu1 %v2825_v46  ;;  %v646_v46 = vld [vmem:[%s3416_s5 + $0x6b8] sm:$0xff] }
 0x3fd   : > { %2440 = vmatpush1.bf16.msra.mxu0 %v2856_v47  ;;  %v2920_v56 = vcombine.low %v642_v45, %v646_v46 }
 0x3fe   : > { %2441 = vmatprep.subr.bf16.mxu0 %v2849_v53 }
 0x3ff   : > { %2407 = vmatpush2.bf16.msra.mxu1 %v2824_v49  ;;  %v2921_v49 = vcombine.high %v642_v45, %v646_v46 }
 0x400   : > { %2408 = vmatprep.subr.bf16.mxu1 %v2817_v54  ;;  %v638_v54 = vld [vmem:[%s3416_s5 + $0x678] sm:$0xff] }
 0x401   : > { %2442 = vmatpush1.bf16.msra.mxu0 %v2848_v55  ;;  %v2913_v57 = vcombine.high %v634_v52, %v638_v54  ;;  %v2912_v1 = vcombine.low %v634_v52, %v638_v54 }
 0x402   : > { %2443 = vmatprep.subr.bf16.mxu0 %v2841_v58  ;;  %v626_v58 = vld [vmem:[%s3416_s5 + $0x618] sm:$0xff] }
 0x403   : > { %2409 = vmatpush2.bf16.msra.mxu1 %v2816_v59  ;;  %v630_v59 = vld [vmem:[%s3416_s5 + $0x638] sm:$0xff]  ;;  %s3273_s5 = smov [#allocation7]  }
 0x404   : > { %2410 = vmatprep.subr.bf16.mxu1 %v2809_v61  ;;  %v2905_v60 = vcombine.high %v626_v58, %v630_v59  ;;  %v2904_v63 = vcombine.low %v626_v58, %v630_v59  ;;  %s3175_s7 = sshll.u32 %s3273_s5, 4  ;;  %s3176_s7 = int_to_ptr.vmem [resolvable:$false] %s3175_s7 }
 0x405   : > { %2444 = vmatpush1.bf16.msra.mxu0 %v2840_v62  ;;  %s3177_s15 = scalar_lea.vmem %s3176_s7, 512  ;;  %p3178_p5 = scmp.lt.s32.totalorder %s2575_s23, %s3176_s7 }
 0x406   : > { %2445 = vmatprep.subr.bf16.mxu0 %v2961_v3  ;;  %p3179_p12 = scmp.lt.s32.totalorder %s3177_s15, %s3171_s22 }
 0x407   : > { %2411 = vmatpush2.bf16.msra.mxu1 %v2808_v4 }
 0x408   : > { %2412 = vmatprep.subr.bf16.mxu1 %v2801_v7  ;;  %p3180_p6 = por %p3179_p12, %p3178_p5 }
 0x409   : > { %2446 = vmatpush2.bf16.msra.mxu0 %v2960_v8 }
 0x40a   : > { %v3763_v20 = vpop.f32.mrf.mxu1  ;;  %2447 = vmatprep.subr.bf16.mxu0 %v2953_v12  ;;  %p3181_p7 = pnand %p3180_p6, %p3174_p13 }
 0x40b   : > { %2413 = vmatpush2.bf16.msra.mxu1 %v2800_v13 }
 0x40c   : > { %v3767_v25 = vpop.f32.mrf.mxu1  ;;  %2414 = vmatprep.subr.bf16.mxu1 %v2793_v16 }
 0x40d   : > { %2448 = vmatpush2.bf16.msra.mxu0 %v2952_v17 }
 0x40e   : > { %v2057_v31 = vpop.f32.mrf.mxu1  ;;  %2449 = vmatprep.subr.bf16.mxu0 %v2945_v21 }
 0x40f   : > { %2415 = vmatpush2.bf16.msra.mxu1 %v2792_v23 }
 0x410   : > { %v2058_v37 = vpop.f32.mrf.mxu1  ;;  %2416 = vmatprep.subr.bf16.mxu1 %v2785_v26 }
 0x411   : > { %2450 = vmatpush2.bf16.msra.mxu0 %v2944_v27 }
 0x412   : > { %v2135_v42 = vpop.f32.mrf.mxu1  ;;  %2451 = vmatprep.subr.bf16.mxu0 %v2937_v32 }
 0x413   : > { %2417 = vmatpush2.bf16.msra.mxu1 %v2784_v33 }
 0x414   : > { %v2137_v47 = vpop.f32.mrf.mxu1  ;;  %2418 = vmatprep.subr.bf16.mxu1 %v2777_v38 }
 0x415   : > { %2452 = vmatpush2.bf16.msra.mxu0 %v2936_v39 }
 0x416   : > { %v2139_v53 = vpop.f32.mrf.mxu1  ;;  %2453 = vmatprep.subr.bf16.mxu0 %v2929_v43 }
 0x417   : > { %2419 = vmatpush2.bf16.msra.mxu1 %v2776_v44 }
 0x418   : > { %v2140_v55 = vpop.f32.mrf.mxu1  ;;  %2484 = vmatprep.subr.bf16.mxu1 %v2969_v48 }
 0x419   : > { %2454 = vmatpush2.bf16.msra.mxu0 %v2928_v51 }
 0x41a   : > { %2421 = vmatmul.mubr.bf16.vlgmr.msra.gmra.mxu1 %v3539_v0  ;;  %2455 = vmatprep.subr.bf16.mxu0 %v2921_v49 }
 0x41b   : > { %2485 = vmatpush1.bf16.msra.mxu1 %v2968_v50  ;;  %2502 = vmatprep.mubr.bf16.mxu1 %v3268_v29 }
 0x41d   : > { %2456 = vmatpush2.bf16.msra.mxu0 %v2920_v56 }
 0x41e   : > { %2457 = vmatprep.subr.bf16.mxu0 %v2913_v57 }
 0x420   : > { %v2094_v61 = vpop.f32.mrf.mxu0 }
 0x421   : > { %2458 = vmatpush2.bf16.msra.mxu0 %v2912_v1  ;;  %v2095_v62 = vadd.f32 %v2094_v61, %v3763_v20  ;;  %v2525_v20 = vshrl.u32 %v2524_v15, 7 }
 0x422   : > { %2973 = vmatmul.mubr.msk.bf16.vlgmr.msra.gmra.mxu1 %vm2015_vm4, %v3552_v10  ;;  %v2096_v0 = vpop.f32.mrf.mxu0  ;;  %2459 = vmatprep.subr.bf16.mxu0 %v2905_v60  ;;  %v2522_v10 = vunpack.c.l.s4 %v3272_v14 }
 0x423   : > { %v2136_v2 = vadd.f32 %v2135_v42, %v2095_v62  ;;  %v2097_v3 = vadd.f32 %v2096_v0, %v3767_v25 }
 0x424   : > { %v2098_v29 = vpop.f32.mrf.mxu0  ;;  %v2523_v19 = vunpack.c.0.s8 %v2522_v10 }
 0x425   : > { %v2138_v4 = vadd.f32 %v2137_v47, %v2097_v3  ;;  %2460 = vmatpush2.bf16.msra.mxu0 %v2904_v63 }
 0x426   : > { %v2099_v5 = vpop.f32.mrf.mxu0 }
 0x427   : > { %v2519_v6 = vcombine.low %v2136_v2, %v2138_v4 }
 0x428   : > { %2462 = vmatmul.mubr.bf16.vlgmr.msra.gmra.mxu0 %v3569_v35  ;;  %v2526_v35 = vsub.s32 %v2523_v19, %v2525_v20 }
 0x42a   : > { %v2527_v30 = vrot.slane %v2519_v6, %v2526_v35 }
 0x452   : > { %v2176_v7 = vpop.f32.mrf.mxu1 }
 0x454   : > { %v2178_v8 = vpop.f32.mrf.mxu1 }
 0x456   : > { %v2180_v22 = vpop.f32.mrf.mxu1 }
 0x458   : > { %v2181_v11 = vpop.f32.mrf.mxu1 }
 0x45a   : > { %v2258_v12 = vpop.f32.mrf.mxu1 }
 0x45c   : > { %v2260_v13 = vpop.f32.mrf.mxu1 }
 0x45e   : > { %v2262_v16 = vpop.f32.mrf.mxu1 }
 0x460   : > { %v2217_v17 = vpop.f32.mrf.mxu0  ;;  %v2263_v18 = vpop.f32.mrf.mxu1 }
 0x461   : > { %v2218_v21 = vadd.f32 %v2217_v17, %v2176_v7 }
 0x462   : > { %v2219_v23 = vpop.f32.mrf.mxu0 }
 0x463   : > { %v2220_v24 = vadd.f32 %v2219_v23, %v2178_v8  ;;  %v2259_v25 = vadd.f32 %v2258_v12, %v2218_v21 }
 0x464   : > { %v2221_v36 = vpop.f32.mrf.mxu0 }
 0x465   : > { %v2261_v26 = vadd.f32 %v2260_v13, %v2220_v24 }
 0x466   : > { %v2222_v27 = vpop.f32.mrf.mxu0 }
 0x467   : > { %v2520_v28 = vcombine.low %v2259_v25, %v2261_v26 }
 0x469   : > { %v2534_v31 = vrot.slane %v2520_v28, %v2526_v35 }
 0x46b   : > { %v2535_v32 = vcombine.low %v2527_v30, %v2534_v31 }
 0x46d   : > { %2555 = vst [vmem:[%s3789_s10] sm:$0xff] %v2535_v32 }
 0x49a   : > { %v2340_v33 = vpop.f32.mrf.mxu1 }
 0x49c   : > { %v2342_v34 = vpop.f32.mrf.mxu1 }
 0x49e   : > { %v2344_v9 = vpop.f32.mrf.mxu1 }
 0x4a0   : > { %v2345_v37 = vpop.f32.mrf.mxu1  ;;  %v2299_v38 = vpop.f32.mrf.mxu0 }
 0x4a1   : > { %v2341_v39 = vadd.f32 %v2340_v33, %v2299_v38 }
 0x4a2   : > { %v2301_v40 = vpop.f32.mrf.mxu0 }
 0x4a3   : > { %v2343_v41 = vadd.f32 %v2342_v34, %v2301_v40 }
 0x4a4   : > { %v2303_v42 = vpop.f32.mrf.mxu0 }
 0x4a6   : > { %v2304_v43 = vpop.f32.mrf.mxu0 }
 0x4a8   : > { %v2381_v44 = vpop.f32.mrf.mxu0 }
 0x4a9   : > { %v2382_v45 = vadd.f32 %v2381_v44, %v2341_v39 }
 0x4aa   : > { %v2383_v46 = vpop.f32.mrf.mxu0 }
 0x4ab   : > { %v2384_v47 = vadd.f32 %v2383_v46, %v2343_v41 }
 0x4ac   : > { %v2385_v48 = vpop.f32.mrf.mxu0 }
 0x4ad   : > { %v2536_v51 = vcombine.low %v2382_v45, %v2384_v47 }
 0x4ae   : > { %v2386_v53 = vpop.f32.mrf.mxu0 }
 0x4af   : > { %v2544_v29 = vrot.slane %v2536_v51, %v2526_v35 }
 0x4da   : > { %v2422_v49 = vpop.f32.mrf.mxu1 }
 0x4dc   : > { %v2424_v50 = vpop.f32.mrf.mxu1 }
 0x4de   : > { %v2426_v52 = vpop.f32.mrf.mxu1 }
 0x4e0   : > { %v2427_v54 = vpop.f32.mrf.mxu1 }
 0x4e2   : > { %v2504_v55 = vpop.f32.mrf.mxu1 }
 0x4e4   : > { %v2506_v56 = vpop.f32.mrf.mxu1 }
 0x4e6   : > { %v2508_v57 = vpop.f32.mrf.mxu1 }
 0x4e8   : > { %v2463_v58 = vpop.f32.mrf.mxu0  ;;  %v2509_v59 = vpop.f32.mrf.mxu1 }
 0x4e9   : > { %v2464_v1 = vadd.f32 %v2463_v58, %v2422_v49 }
 0x4ea   : > { %v2465_v60 = vpop.f32.mrf.mxu0 }
 0x4eb   : > { %v2466_v61 = vadd.f32 %v2465_v60, %v2424_v50  ;;  %v2505_v63 = vadd.f32 %v2504_v55, %v2464_v1 }
 0x4ec   : > { %v2467_v62 = vpop.f32.mrf.mxu0 }
 0x4ed   : > { %v2507_v0 = vadd.f32 %v2506_v56, %v2466_v61 }
 0x4ee   : > { %v2468_v2 = vpop.f32.mrf.mxu0 }
 0x4ef   : > { %v2537_v3 = vcombine.low %v2505_v63, %v2507_v0 }
 0x4f1   : > { %v2551_v4 = vrot.slane %v2537_v3, %v2526_v35 }
 0x4f3   : > { %v2552_v5 = vcombine.low %v2544_v29, %v2551_v4 }
 0x4f5   : > { %2556 = vst [vmem:[%s3789_s10 + $0x8] sm:$0xff] %v2552_v5 }
 0x4f6   : > { %3184 = shalt.err (!%p3181_p7)
}
 0x4f7   : > { %s3185_s11 = scalar_lea.hbm %s2572_s4, 256  ;;  %s3189_s19 = scalar_lea.hbm %s3837_s3, 512 }
 0x4f8   : > { %p3186_p1 = scmp.ne.s32.totalorder %s2572_s4, %s3185_s11  ;;  %p3190_p10 = scmp.lt.s32.totalorder %s2572_s4, %s3837_s3 }
 0x4f9   : > { %p3191_p0 = scmp.lt.s32.totalorder %s3189_s19, %s3185_s11 }
 0x4fa   : > { %p3187_p2 = pnand %p3186_p1, %p3345_p9 }
 0x4fb   : > { %p3192_p8 = por %p3191_p0, %p3190_p10 }
 0x4fc   : > { %p3188_p4 = pneg %p3187_p2 }
 0x4fe   : > { %p3193_p3 = pnand %p3192_p8, %p3188_p4 }
 0x500   : > { %3196 = shalt.err (!%p3193_p3)
}
 0x501   : > { %3016 = dma.vmem_to_hbm [thread:$0]  (%p3345_p9), %s2575_s23, 256, %s2572_s4, %s2558_s9  }
 0x502 PF: > { %s2586_s8 = sand.u32 1, %s3235_s12   ;;  %p3844_p13 = scmp.ge.s32.totalorder %s3255_s17, 2 }
 0x503   : > { %s2587_s10 = scalar_lea.sflag [#allocation4], %s2586_s8 }
 0x504   : > { %p3026_p5 = pnand %p3844_p13, %p3352_p11 }
 0x506   : > { %p3027_p12 = pneg %p3026_p5 }
 0x508   : > { %3230 = dma.done.wait (%p3027_p12), %s2587_s10, 256  }
 0x509   : > { %3232 = vsyncadd (%p3027_p12), %s2587_s10, 4294967040  ;;  %s22_s17 = sadd.s32 1, %s3255_s17   ;;  %s3845_s12 = smov %s3239_s13 }
 0x50a   : > { %p19_p6 = scmp.ge.s32.totalorder %s22_s17, 4   ;;  %s3846_s13 = smov %s3243_s14 }
 0x50b   : > { %s3847_s14 = smov %s3350_s26  ;;  %s3848_s15 = smov %s3251_s16 }
 0x50c   : > { %s3849_s16 = smov %s3851_s20  ;;  %21 = sbr.rel (!%p19_p6) target bundleno = 8 (0x8), region = 93 }
 0x511   :  { %2592 = vsyncpa [#allocation3], 1 }
 0x512   :  { %2594 = vsyncpa [#allocation3 + $0x1], 1 }
 0x513   :  { %2595 = vsyncpa [#allocation6], 1 }
 0x514   :  { %2597 = vsyncpa [#allocation6 + $0x1], 1 }
 0x515   :  { %2598 = vsyncpa [#allocation4], 1 }
 0x516   :  { %2600 = vsyncpa [#allocation4 + $0x1], 1 }

</bundles_post_ra>
